<compile_context>
chip_gen: v6e
topology: v6e:2x2x1
jax: 0.10.0
libtpu: 0.0.40
codegen_flags: <defaults>
</compile_context>

<pallas_src>
import jax
import jax.numpy as jnp
from jax import lax
from jax.experimental import pallas as pl
from jax.experimental.pallas import tpu as pltpu


def _cnn_kernel(x_ref, w1_ref, b1_ref, w2_ref, b2_ref, fcw_ref, fcb_ref, out_ref):
    N, _ = x_ref.shape            # N = tb * L rows (batch-major, length-minor)
    tb, _ = out_ref.shape
    L = N // tb

    x = x_ref[...]                # (N, C)

    # Per-batch boundary masks: rows whose l-1 / l+1 neighbour is the zero pad.
    row = lax.broadcasted_iota(jnp.int32, (N, 1), 0)
    first = (row % L) == 0
    last = (row % L) == (L - 1)

    def conv3(h, w_ref, b_ref):
        """k=3, pad=1 Conv1d over the (N, Cin) row-major layout.

        out[l] = h[l-1] @ w[0] + h[l] @ w[1] + h[l+1] @ w[2] + b, then ReLU.
        The shifts are applied to the matmul *outputs* via XLU rolls, with
        batch-boundary rows masked to zero (they correspond to the zero pad).
        """
        p0 = jnp.dot(h, w_ref[0], preferred_element_type=jnp.float32)
        p1 = jnp.dot(h, w_ref[1], preferred_element_type=jnp.float32)
        p2 = jnp.dot(h, w_ref[2], preferred_element_type=jnp.float32)
        prev = jnp.where(first, 0.0, pltpu.roll(p0, 1, axis=0))       # p0[l-1]
        nxt = jnp.where(last, 0.0, pltpu.roll(p2, N - 1, axis=0))     # p2[l+1]
        return jnp.maximum(p1 + prev + nxt + b_ref[...], 0.0)

    h1 = conv3(x, w1_ref, b1_ref)       # (N, 64)
    h2 = conv3(h1, w2_ref, b2_ref)      # (N, 64)

    # AdaptiveAvgPool1d(1): sum over L (the 1/L factor is folded into fcw).
    pooled = jnp.sum(h2.reshape(tb, L, 64), axis=1)                   # (tb, 64)

    out_ref[...] = (jnp.dot(pooled, fcw_ref[...],
                            preferred_element_type=jnp.float32) + fcb_ref[...])


def _pick_tb(B, L, target_rows):
    """Batch tile so tb*L ~= target_rows, tb a multiple of 8 dividing B."""
    tb = max(8, target_rows // max(L, 1))
    if tb >= B:
        return B                       # single grid step; block == full array
    tb = (tb // 8) * 8
    t = tb
    while t >= 8:                      # prefer a divisor of B (no HBM padding)
        if B % t == 0:
            return t
        t -= 8
    return tb                          # fall back: pad B up to a multiple of tb


def cnn_model_pallas(x, params, target_rows=2048):
    """x: (B, L, C) float32.  params in PyTorch layouts:
         w1:(64,C,3) b1:(64,) w2:(64,64,3) b2:(64,) fcw:(nc,64) fcb:(nc,)
       Returns (B, num_classes) float32."""
    w1, b1, w2, b2, fcw, fcb = params
    B, L, C = x.shape
    num_classes = fcw.shape[0]

    tb = _pick_tb(B, L, target_rows)
    B_pad = ((B + tb - 1) // tb) * tb
    if B_pad != B:
        x = jnp.pad(x, ((0, B_pad - B), (0, 0), (0, 0)))

    # Free HBM reshape: (B_pad, L, C) -> (B_pad*L, C); kernel never reshapes x.
    x_flat = x.reshape(B_pad * L, C)

    # PyTorch (out, in, k) -> (tap, in, out) so each tap is an (in, out) matmul.
    w1t = jnp.transpose(w1, (2, 1, 0))                 # (3, C, 64)
    w2t = jnp.transpose(w2, (2, 1, 0))                 # (3, 64, 64)
    b1r = b1.reshape(1, 64)
    b2r = b2.reshape(1, 64)
    fcwt = jnp.transpose(fcw) * (1.0 / L)              # (64, nc), pool 1/L folded in
    fcbr = fcb.reshape(1, num_classes)

    # VMEM budget: ~ (2x double-buffered x tile + live f32 intermediates), with
    # headroom; capped below v7x's 64 MiB physical VMEM, floor above v5e's 16 MiB
    # scoped default.
    n_rows = tb * L
    est_bytes = n_rows * 4 * (2 * 128 + 8 * 128)
    vmem_limit = int(min(48 * 1024 * 1024, max(32 * 1024 * 1024, 2 * est_bytes)))

    out = pl.pallas_call(
        _cnn_kernel,
        out_shape=jax.ShapeDtypeStruct((B_pad, num_classes), jnp.float32),
        grid_spec=pltpu.PrefetchScalarGridSpec(
            num_scalar_prefetch=0,
            grid=(B_pad // tb,),
            in_specs=[
                pl.BlockSpec((tb * L, C), lambda b: (b, 0)),            # x rows
                pl.BlockSpec((3, C, 64), lambda b: (0, 0, 0)),          # conv1 w
                pl.BlockSpec((1, 64), lambda b: (0, 0)),                # conv1 b
                pl.BlockSpec((3, 64, 64), lambda b: (0, 0, 0)),         # conv2 w
                pl.BlockSpec((1, 64), lambda b: (0, 0)),                # conv2 b
                pl.BlockSpec((64, num_classes), lambda b: (0, 0)),      # fc w
                pl.BlockSpec((1, num_classes), lambda b: (0, 0)),       # fc b
            ],
            out_specs=pl.BlockSpec((tb, num_classes), lambda b: (b, 0)),
        ),
        compiler_params=pltpu.CompilerParams(
            dimension_semantics=("parallel",),
            vmem_limit_bytes=vmem_limit),
    )(x_flat, w1t, b1r, w2t, b2r, fcwt, fcbr)

    return out[:B]


def _reference(x, params):
    """Pure-JAX reference mirroring the PyTorch graph (NCW conv, PyTorch layouts)."""
    w1, b1, w2, b2, fcw, fcb = params
    xc = jnp.transpose(x, (0, 2, 1))                          # (B, C, L)
    h = lax.conv_general_dilated(
        xc, w1, window_strides=(1,), padding=((1, 1),),
        dimension_numbers=("NCW", "OIW", "NCW"))
    h = jax.nn.relu(h + b1[None, :, None])
    h = lax.conv_general_dilated(
        h, w2, window_strides=(1,), padding=((1, 1),),
        dimension_numbers=("NCW", "OIW", "NCW"))
    h = jax.nn.relu(h + b2[None, :, None])
    pooled = jnp.mean(h, axis=-1)                             # (B, 64)
    return pooled @ fcw.T + fcb


if __name__ == "__main__":
    B, L, C = 16, 16, 4
    num_classes = 8

    key = jax.random.PRNGKey(0)
    kx, k1, k2, k3, k4, k5, k6 = jax.random.split(key, 7)

    x = jax.random.normal(kx, (B, L, C), jnp.float32)

    # Weights generated in the PyTorch layouts; the wrapper handles transposes.
    w1 = jax.random.normal(k1, (64, C, 3), jnp.float32) * 0.1      # Conv1d(C->64, k=3)
    b1 = jax.random.normal(k2, (64,), jnp.float32) * 0.1
    w2 = jax.random.normal(k3, (64, 64, 3), jnp.float32) * 0.05    # Conv1d(64->64, k=3)
    b2 = jax.random.normal(k4, (64,), jnp.float32) * 0.1
    fcw = jax.random.normal(k5, (num_classes, 64), jnp.float32) * 0.1  # Linear(64->nc)
    fcb = jax.random.normal(k6, (num_classes,), jnp.float32) * 0.1
    params = (w1, b1, w2, b2, fcw, fcb)

    out = cnn_model_pallas(x, params)           # tb=B=16 -> grid=(1,) on this size
    jax.block_until_ready(out)

    ref = _reference(x, params)
    assert out.shape == (B, num_classes)
    assert jnp.allclose(out, ref, atol=1e-4, rtol=1e-4), "mismatch vs reference"

    print("KERNEL_OK")
</pallas_src>

<mosaic_0001>
module attributes {stable_mosaic.version = 11 : i64} {
  func.func @_cnn_kernel(%arg0: i32, %arg1: memref<256x4xf32, #tpu.memory_space<vmem>>, %arg2: memref<3x4x64xf32, #tpu.memory_space<vmem>>, %arg3: memref<1x64xf32, #tpu.memory_space<vmem>>, %arg4: memref<3x64x64xf32, #tpu.memory_space<vmem>>, %arg5: memref<1x64xf32, #tpu.memory_space<vmem>>, %arg6: memref<64x8xf32, #tpu.memory_space<vmem>>, %arg7: memref<1x8xf32, #tpu.memory_space<vmem>>, %arg8: memref<16x8xf32, #tpu.memory_space<vmem>>) attributes {dimension_semantics = [#tpu.dimension_semantics<parallel>], iteration_bounds = array<i64: 1>, scalar_prefetch = 0 : i64, scratch_operands = 0 : i64, tpu.core_type = #tpu.core_type<tc>, window_params = [{transform_indices = @transform_0, window_bounds = array<i64: 256, 4>}, {pipeline_mode = #tpu.pipeline_mode<synchronous>, transform_indices = @transform_1, window_bounds = array<i64: 3, 4, 64>}, {pipeline_mode = #tpu.pipeline_mode<synchronous>, transform_indices = @transform_2, window_bounds = array<i64: 1, 64>}, {pipeline_mode = #tpu.pipeline_mode<synchronous>, transform_indices = @transform_3, window_bounds = array<i64: 3, 64, 64>}, {pipeline_mode = #tpu.pipeline_mode<synchronous>, transform_indices = @transform_4, window_bounds = array<i64: 1, 64>}, {pipeline_mode = #tpu.pipeline_mode<synchronous>, transform_indices = @transform_5, window_bounds = array<i64: 64, 8>}, {pipeline_mode = #tpu.pipeline_mode<synchronous>, transform_indices = @transform_6, window_bounds = array<i64: 1, 8>}, {transform_indices = @transform_7, window_bounds = array<i64: 16, 8>}]} {
    %c0 = arith.constant 0 : index
    %c0_0 = arith.constant 0 : index
    %0 = vector.load %arg1[%c0, %c0_0] : memref<256x4xf32, #tpu.memory_space<vmem>>, vector<256x4xf32>
    %1 = tpu.iota {dimensions = array<i32: 0>} : vector<256x1xi32>
    %c16_i32 = arith.constant 16 : i32
    %c0_i32 = arith.constant 0 : i32
    %2 = arith.cmpi eq, %c16_i32, %c0_i32 : i32
    %c1_i32 = arith.constant 1 : i32
    %3 = arith.select %2, %c1_i32, %c16_i32 : i32
    %4 = vector.broadcast %3 : i32 to vector<256x1xi32>
    %5 = arith.remsi %1, %4 : vector<256x1xi32>
    %c0_i32_1 = arith.constant 0 : i32
    %6 = vector.broadcast %c0_i32_1 : i32 to vector<256x1xi32>
    %7 = arith.cmpi ne, %5, %6 : vector<256x1xi32>
    %c0_i32_2 = arith.constant 0 : i32
    %8 = vector.broadcast %c0_i32_2 : i32 to vector<256x1xi32>
    %9 = arith.cmpi slt, %5, %8 : vector<256x1xi32>
    %c0_i32_3 = arith.constant 0 : i32
    %10 = arith.cmpi slt, %3, %c0_i32_3 : i32
    %11 = vector.broadcast %10 : i1 to vector<256x1xi1>
    %12 = vector.broadcast %11 : vector<256x1xi1> to vector<256x1xi1>
    %13 = arith.xori %9, %12 : vector<256x1xi1>
    %14 = arith.andi %13, %7 : vector<256x1xi1>
    %15 = vector.broadcast %3 : i32 to vector<256x1xi32>
    %16 = arith.addi %5, %15 : vector<256x1xi32>
    %17 = arith.select %14, %16, %5 : vector<256x1xi1>, vector<256x1xi32>
    %c0_i32_4 = arith.constant 0 : i32
    %18 = vector.broadcast %c0_i32_4 : i32 to vector<256x1xi32>
    %19 = arith.cmpi eq, %17, %18 : vector<256x1xi32>
    %c16_i32_5 = arith.constant 16 : i32
    %c0_i32_6 = arith.constant 0 : i32
    %20 = arith.cmpi eq, %c16_i32_5, %c0_i32_6 : i32
    %c1_i32_7 = arith.constant 1 : i32
    %21 = arith.select %20, %c1_i32_7, %c16_i32_5 : i32
    %22 = vector.broadcast %21 : i32 to vector<256x1xi32>
    %23 = arith.remsi %1, %22 : vector<256x1xi32>
    %c0_i32_8 = arith.constant 0 : i32
    %24 = vector.broadcast %c0_i32_8 : i32 to vector<256x1xi32>
    %25 = arith.cmpi ne, %23, %24 : vector<256x1xi32>
    %c0_i32_9 = arith.constant 0 : i32
    %26 = vector.broadcast %c0_i32_9 : i32 to vector<256x1xi32>
    %27 = arith.cmpi slt, %23, %26 : vector<256x1xi32>
    %c0_i32_10 = arith.constant 0 : i32
    %28 = arith.cmpi slt, %21, %c0_i32_10 : i32
    %29 = vector.broadcast %28 : i1 to vector<256x1xi1>
    %30 = vector.broadcast %29 : vector<256x1xi1> to vector<256x1xi1>
    %31 = arith.xori %27, %30 : vector<256x1xi1>
    %32 = arith.andi %31, %25 : vector<256x1xi1>
    %33 = vector.broadcast %21 : i32 to vector<256x1xi32>
    %34 = arith.addi %23, %33 : vector<256x1xi32>
    %35 = arith.select %32, %34, %23 : vector<256x1xi1>, vector<256x1xi32>
    %c15_i32 = arith.constant 15 : i32
    %36 = vector.broadcast %c15_i32 : i32 to vector<256x1xi32>
    %37 = arith.cmpi eq, %35, %36 : vector<256x1xi32>
    %c0_11 = arith.constant 0 : index
    %c0_12 = arith.constant 0 : index
    %c0_13 = arith.constant 0 : index
    %38 = vector.load %arg2[%c0_11, %c0_12, %c0_13] : memref<3x4x64xf32, #tpu.memory_space<vmem>>, vector<1x4x64xf32>
    %39 = vector.shape_cast %38 : vector<1x4x64xf32> to vector<4x64xf32>
    %cst = arith.constant dense<0.000000e+00> : vector<256x64xf32>
    %40 = tpu.matmul %0, %39, %cst {dimension_numbers = #tpu.dot_dimension_numbers<[1], [0], [0], [1], [0, 0, 1, 1], [], []>} : vector<256x4xf32>, vector<4x64xf32>, vector<256x64xf32> -> vector<256x64xf32>
    %c1 = arith.constant 1 : index
    %c0_14 = arith.constant 0 : index
    %c0_15 = arith.constant 0 : index
    %41 = vector.load %arg2[%c1, %c0_14, %c0_15] : memref<3x4x64xf32, #tpu.memory_space<vmem>>, vector<1x4x64xf32>
    %42 = vector.shape_cast %41 : vector<1x4x64xf32> to vector<4x64xf32>
    %cst_16 = arith.constant dense<0.000000e+00> : vector<256x64xf32>
    %43 = tpu.matmul %0, %42, %cst_16 {dimension_numbers = #tpu.dot_dimension_numbers<[1], [0], [0], [1], [0, 0, 1, 1], [], []>} : vector<256x4xf32>, vector<4x64xf32>, vector<256x64xf32> -> vector<256x64xf32>
    %c2 = arith.constant 2 : index
    %c0_17 = arith.constant 0 : index
    %c0_18 = arith.constant 0 : index
    %44 = vector.load %arg2[%c2, %c0_17, %c0_18] : memref<3x4x64xf32, #tpu.memory_space<vmem>>, vector<1x4x64xf32>
    %45 = vector.shape_cast %44 : vector<1x4x64xf32> to vector<4x64xf32>
    %cst_19 = arith.constant dense<0.000000e+00> : vector<256x64xf32>
    %46 = tpu.matmul %0, %45, %cst_19 {dimension_numbers = #tpu.dot_dimension_numbers<[1], [0], [0], [1], [0, 0, 1, 1], [], []>} : vector<256x4xf32>, vector<4x64xf32>, vector<256x64xf32> -> vector<256x64xf32>
    %c1_i32_20 = arith.constant 1 : i32
    %47 = tpu.dynamic_rotate %40 by %c1_i32_20 dim 0 : vector<256x64xf32>, i32 -> vector<256x64xf32>
    %cst_21 = arith.constant 0.000000e+00 : f32
    %48 = vector.shape_cast %19 : vector<256x1xi1> to vector<256x1xi1>
    %49 = vector.broadcast %48 : vector<256x1xi1> to vector<256x64xi1>
    %50 = vector.broadcast %cst_21 : f32 to vector<256x64xf32>
    %51 = arith.select %49, %50, %47 : vector<256x64xi1>, vector<256x64xf32>
    %c255_i32 = arith.constant 255 : i32
    %52 = tpu.dynamic_rotate %46 by %c255_i32 dim 0 : vector<256x64xf32>, i32 -> vector<256x64xf32>
    %cst_22 = arith.constant 0.000000e+00 : f32
    %53 = vector.shape_cast %37 : vector<256x1xi1> to vector<256x1xi1>
    %54 = vector.broadcast %53 : vector<256x1xi1> to vector<256x64xi1>
    %55 = vector.broadcast %cst_22 : f32 to vector<256x64xf32>
    %56 = arith.select %54, %55, %52 : vector<256x64xi1>, vector<256x64xf32>
    %57 = arith.addf %43, %51 : vector<256x64xf32>
    %58 = arith.addf %57, %56 : vector<256x64xf32>
    %c0_23 = arith.constant 0 : index
    %c0_24 = arith.constant 0 : index
    %59 = vector.load %arg3[%c0_23, %c0_24] : memref<1x64xf32, #tpu.memory_space<vmem>>, vector<1x64xf32>
    %60 = vector.broadcast %59 : vector<1x64xf32> to vector<256x64xf32>
    %61 = arith.addf %58, %60 : vector<256x64xf32>
    %cst_25 = arith.constant 0.000000e+00 : f32
    %62 = vector.broadcast %cst_25 : f32 to vector<256x64xf32>
    %63 = arith.maximumf %61, %62 : vector<256x64xf32>
    %c0_26 = arith.constant 0 : index
    %c0_27 = arith.constant 0 : index
    %c0_28 = arith.constant 0 : index
    %64 = vector.load %arg4[%c0_26, %c0_27, %c0_28] : memref<3x64x64xf32, #tpu.memory_space<vmem>>, vector<1x64x64xf32>
    %65 = vector.shape_cast %64 : vector<1x64x64xf32> to vector<64x64xf32>
    %cst_29 = arith.constant dense<0.000000e+00> : vector<256x64xf32>
    %66 = tpu.matmul %63, %65, %cst_29 {dimension_numbers = #tpu.dot_dimension_numbers<[1], [0], [0], [1], [0, 0, 1, 1], [], []>} : vector<256x64xf32>, vector<64x64xf32>, vector<256x64xf32> -> vector<256x64xf32>
    %c1_30 = arith.constant 1 : index
    %c0_31 = arith.constant 0 : index
    %c0_32 = arith.constant 0 : index
    %67 = vector.load %arg4[%c1_30, %c0_31, %c0_32] : memref<3x64x64xf32, #tpu.memory_space<vmem>>, vector<1x64x64xf32>
    %68 = vector.shape_cast %67 : vector<1x64x64xf32> to vector<64x64xf32>
    %cst_33 = arith.constant dense<0.000000e+00> : vector<256x64xf32>
    %69 = tpu.matmul %63, %68, %cst_33 {dimension_numbers = #tpu.dot_dimension_numbers<[1], [0], [0], [1], [0, 0, 1, 1], [], []>} : vector<256x64xf32>, vector<64x64xf32>, vector<256x64xf32> -> vector<256x64xf32>
    %c2_34 = arith.constant 2 : index
    %c0_35 = arith.constant 0 : index
    %c0_36 = arith.constant 0 : index
    %70 = vector.load %arg4[%c2_34, %c0_35, %c0_36] : memref<3x64x64xf32, #tpu.memory_space<vmem>>, vector<1x64x64xf32>
    %71 = vector.shape_cast %70 : vector<1x64x64xf32> to vector<64x64xf32>
    %cst_37 = arith.constant dense<0.000000e+00> : vector<256x64xf32>
    %72 = tpu.matmul %63, %71, %cst_37 {dimension_numbers = #tpu.dot_dimension_numbers<[1], [0], [0], [1], [0, 0, 1, 1], [], []>} : vector<256x64xf32>, vector<64x64xf32>, vector<256x64xf32> -> vector<256x64xf32>
    %c1_i32_38 = arith.constant 1 : i32
    %73 = tpu.dynamic_rotate %66 by %c1_i32_38 dim 0 : vector<256x64xf32>, i32 -> vector<256x64xf32>
    %cst_39 = arith.constant 0.000000e+00 : f32
    %74 = vector.shape_cast %19 : vector<256x1xi1> to vector<256x1xi1>
    %75 = vector.broadcast %74 : vector<256x1xi1> to vector<256x64xi1>
    %76 = vector.broadcast %cst_39 : f32 to vector<256x64xf32>
    %77 = arith.select %75, %76, %73 : vector<256x64xi1>, vector<256x64xf32>
    %c255_i32_40 = arith.constant 255 : i32
    %78 = tpu.dynamic_rotate %72 by %c255_i32_40 dim 0 : vector<256x64xf32>, i32 -> vector<256x64xf32>
    %cst_41 = arith.constant 0.000000e+00 : f32
    %79 = vector.shape_cast %37 : vector<256x1xi1> to vector<256x1xi1>
    %80 = vector.broadcast %79 : vector<256x1xi1> to vector<256x64xi1>
    %81 = vector.broadcast %cst_41 : f32 to vector<256x64xf32>
    %82 = arith.select %80, %81, %78 : vector<256x64xi1>, vector<256x64xf32>
    %83 = arith.addf %69, %77 : vector<256x64xf32>
    %84 = arith.addf %83, %82 : vector<256x64xf32>
    %c0_42 = arith.constant 0 : index
    %c0_43 = arith.constant 0 : index
    %85 = vector.load %arg5[%c0_42, %c0_43] : memref<1x64xf32, #tpu.memory_space<vmem>>, vector<1x64xf32>
    %86 = vector.broadcast %85 : vector<1x64xf32> to vector<256x64xf32>
    %87 = arith.addf %84, %86 : vector<256x64xf32>
    %cst_44 = arith.constant 0.000000e+00 : f32
    %88 = vector.broadcast %cst_44 : f32 to vector<256x64xf32>
    %89 = arith.maximumf %87, %88 : vector<256x64xf32>
    %90 = vector.shape_cast %89 : vector<256x64xf32> to vector<16x16x64xf32>
    %cst_45 = arith.constant dense<0.000000e+00> : vector<16x64xf32>
    %91 = vector.multi_reduction <add>, %90, %cst_45 [1] : vector<16x16x64xf32> to vector<16x64xf32>
    %c0_46 = arith.constant 0 : index
    %c0_47 = arith.constant 0 : index
    %92 = vector.load %arg6[%c0_46, %c0_47] : memref<64x8xf32, #tpu.memory_space<vmem>>, vector<64x8xf32>
    %cst_48 = arith.constant dense<0.000000e+00> : vector<16x8xf32>
    %93 = tpu.matmul %91, %92, %cst_48 {dimension_numbers = #tpu.dot_dimension_numbers<[1], [0], [0], [1], [0, 0, 1, 1], [], []>} : vector<16x64xf32>, vector<64x8xf32>, vector<16x8xf32> -> vector<16x8xf32>
    %c0_49 = arith.constant 0 : index
    %c0_50 = arith.constant 0 : index
    %94 = vector.load %arg7[%c0_49, %c0_50] : memref<1x8xf32, #tpu.memory_space<vmem>>, vector<1x8xf32>
    %95 = vector.broadcast %94 : vector<1x8xf32> to vector<16x8xf32>
    %96 = arith.addf %93, %95 : vector<16x8xf32>
    %c0_51 = arith.constant 0 : index
    %c0_52 = arith.constant 0 : index
    %97 = vector.load %arg8[%c0_51, %c0_52] : memref<16x8xf32, #tpu.memory_space<vmem>>, vector<16x8xf32>
    tpu.vector_store %arg8[%c0_51, %c0_52], %96 {strides = array<i32>} : memref<16x8xf32, #tpu.memory_space<vmem>>, vector<16x8xf32>,
    return
  }
  func.func @transform_0(%arg0: i32) -> (i32, i32) {
    %c0_i32 = arith.constant 0 : i32
    %c0_i32_0 = arith.constant 0 : i32
    return %arg0, %c0_i32 : i32, i32
  }
  func.func @transform_1(%arg0: i32) -> (i32, i32, i32) {
    %c0_i32 = arith.constant 0 : i32
    %c0_i32_0 = arith.constant 0 : i32
    %c0_i32_1 = arith.constant 0 : i32
    %c0_i32_2 = arith.constant 0 : i32
    return %c0_i32, %c0_i32_0, %c0_i32_1 : i32, i32, i32
  }
  func.func @transform_2(%arg0: i32) -> (i32, i32) {
    %c0_i32 = arith.constant 0 : i32
    %c0_i32_0 = arith.constant 0 : i32
    %c0_i32_1 = arith.constant 0 : i32
    return %c0_i32, %c0_i32_0 : i32, i32
  }
  func.func @transform_3(%arg0: i32) -> (i32, i32, i32) {
    %c0_i32 = arith.constant 0 : i32
    %c0_i32_0 = arith.constant 0 : i32
    %c0_i32_1 = arith.constant 0 : i32
    %c0_i32_2 = arith.constant 0 : i32
    return %c0_i32, %c0_i32_0, %c0_i32_1 : i32, i32, i32
  }
  func.func @transform_4(%arg0: i32) -> (i32, i32) {
    %c0_i32 = arith.constant 0 : i32
    %c0_i32_0 = arith.constant 0 : i32
    %c0_i32_1 = arith.constant 0 : i32
    return %c0_i32, %c0_i32_0 : i32, i32
  }
  func.func @transform_5(%arg0: i32) -> (i32, i32) {
    %c0_i32 = arith.constant 0 : i32
    %c0_i32_0 = arith.constant 0 : i32
    %c0_i32_1 = arith.constant 0 : i32
    return %c0_i32, %c0_i32_0 : i32, i32
  }
  func.func @transform_6(%arg0: i32) -> (i32, i32) {
    %c0_i32 = arith.constant 0 : i32
    %c0_i32_0 = arith.constant 0 : i32
    %c0_i32_1 = arith.constant 0 : i32
    return %c0_i32, %c0_i32_0 : i32, i32
  }
  func.func @transform_7(%arg0: i32) -> (i32, i32) {
    %c0_i32 = arith.constant 0 : i32
    %c0_i32_0 = arith.constant 0 : i32
    return %arg0, %c0_i32 : i32, i32
  }
}

</mosaic_0001>

<bundles_post_ra>
// kernel: tpu_custom_call.1
= control target key start
LH: loop header
LB: loop body
LE: loop exit
PB: predicated region body
PF: predicated region fallthrough
CT: control target
= control target key end

     0   :  { %vm637_vm0 = vcmask 1043456   ;;  %vm540_vm1 = vcmask 31744   ;;  %s6269_s1 = inlined_call_operand.vmem [shape: f32[3,4,64], index: 1, kind: input, shape index: {}]   ;;  %s6270_s0 = inlined_call_operand.vmem [shape: f32[256,4], index: 0, kind: input, shape index: {}]   ;;  %s6271_s3 = inlined_call_operand.vmem [shape: f32[3,64,64], index: 3, kind: input, shape index: {}]   ;;  %s6272_s2 = inlined_call_operand.vmem [shape: f32[1,64], index: 2, kind: input, shape index: {}]   ;;  %s6273_s5 = inlined_call_operand.vmem [shape: f32[64,8], index: 5, kind: input, shape index: {}]   ;;  %s6274_s4 = inlined_call_operand.vmem [shape: f32[1,64], index: 4, kind: input, shape index: {}]   ;;  %s6275_s6 = inlined_call_operand.vmem [shape: f32[1,8], index: 6, kind: input, shape index: {}]   ;;  %s6276_s7 = inlined_call_operand.vmem [shape: f32[16,8], index: 7, kind: output, shape index: {}]  }
   0x1   :  { %v539_v0 = vld [vmem:[%s6269_s1] sm:$0xf]  ;;  %v3160_v1 = vld [vmem:[%s6269_s1 + $0x8] sm:$0xf]  ;;  %v3159_v4 = vld [vmem:[%s6269_s1 + $0x4] sm:$0xf] }
   0x2   :  { %v3983_v2 = vld [vmem:[%s6270_s0] sm:$0xff]  ;;  %3573 = vmatprep.subr.msk.mxu0 %vm637_vm0, %v539_v0  ;;  %3623 = vmatprep.subr.msk.mxu1 %vm637_vm0, %v3160_v1  ;;  %v3990_v3 = vld [vmem:[%s6270_s0 + $0x8] sm:$0xff]  ;;  %v4001_v5 = vld [vmem:[%s6270_s0 + $0x10] sm:$0xff] }
   0x3   :  { %3574 = vmatpush3.msk.msra.mxu0 %vm637_vm0, %v539_v0  ;;  %3575 = vmatprep.mubr.msk.f32.mxu0 %vm540_vm1, %v3983_v2  ;;  %v4016_v6 = vld [vmem:[%s6270_s0 + $0x18] sm:$0xff]  ;;  %v4024_v7 = vld [vmem:[%s6270_s0 + $0x20] sm:$0xff]  ;;  %v4037_v8 = vld [vmem:[%s6270_s0 + $0x28] sm:$0xff] }
   0x4   :  { %3624 = vmatpush3.msk.msra.mxu1 %vm637_vm0, %v3160_v1  ;;  %3625 = vmatprep.mubr.msk.f32.mxu1 %vm540_vm1, %v3983_v2  ;;  %v4042_v9 = vld [vmem:[%s6270_s0 + $0x30] sm:$0xff]  ;;  %v4055_v10 = vld [vmem:[%s6270_s0 + $0x38] sm:$0xff]  ;;  %v4060_v11 = vld [vmem:[%s6270_s0 + $0x40] sm:$0xff] }
   0x5   :  { %3576 = vmatmul.mubr.msk.f32.vlgmr.msra.gmra.mxu0 %vm540_vm1, %v3990_v3  ;;  %3626 = vmatmul.mubr.msk.f32.vlgmr.msra.gmra.mxu1 %vm540_vm1, %v3990_v3  ;;  %v4073_v12 = vld [vmem:[%s6270_s0 + $0x48] sm:$0xff]  ;;  %v4078_v13 = vld [vmem:[%s6270_s0 + $0x50] sm:$0xff]  ;;  %v4091_v14 = vld [vmem:[%s6270_s0 + $0x58] sm:$0xff] }
   0x6   :  { %3673 = vmatprep.subr.msk.mxu0 %vm637_vm0, %v3159_v4  ;;  %3578 = vmatprep.mubr.msk.f32.mxu0 %vm540_vm1, %v4001_v5  ;;  %v4096_v15 = vld [vmem:[%s6270_s0 + $0x60] sm:$0xff]  ;;  %v4109_v16 = vld [vmem:[%s6270_s0 + $0x68] sm:$0xff]  ;;  %v4114_v17 = vld [vmem:[%s6270_s0 + $0x70] sm:$0xff] }
   0x7   :  { %3674 = vmatpush3.msk.msra.mxu0 %vm637_vm0, %v3159_v4  ;;  %3628 = vmatprep.mubr.msk.f32.mxu1 %vm540_vm1, %v4001_v5  ;;  %v4127_v18 = vld [vmem:[%s6270_s0 + $0x78] sm:$0xff]  ;;  %v4132_v19 = vld [vmem:[%s6270_s0 + $0x80] sm:$0xff]  ;;  %v4145_v20 = vld [vmem:[%s6270_s0 + $0x88] sm:$0xff] }
   0x8   :  { %v4150_v21 = vld [vmem:[%s6270_s0 + $0x90] sm:$0xff]  ;;  %v4163_v22 = vld [vmem:[%s6270_s0 + $0x98] sm:$0xff]  ;;  %v4168_v23 = vld [vmem:[%s6270_s0 + $0xa0] sm:$0xff] }
   0x9   :  { %3579 = vmatmul.mubr.msk.f32.gmra.mxu0 %vm540_vm1, %v4016_v6  ;;  %3629 = vmatmul.mubr.msk.f32.gmra.mxu1 %vm540_vm1, %v4016_v6  ;;  %v4181_v24 = vld [vmem:[%s6270_s0 + $0xa8] sm:$0xff]  ;;  %v4186_v25 = vld [vmem:[%s6270_s0 + $0xb0] sm:$0xff]  ;;  %v4199_v26 = vld [vmem:[%s6270_s0 + $0xb8] sm:$0xff] }
   0xa   :  { %3581 = vmatprep.mubr.msk.f32.mxu0 %vm540_vm1, %v4024_v7  ;;  %3631 = vmatprep.mubr.msk.f32.mxu1 %vm540_vm1, %v4024_v7  ;;  %v4204_v27 = vld [vmem:[%s6270_s0 + $0xc0] sm:$0xff]  ;;  %v51_v28 = vld [vmem:[%s6270_s0 + $0xc8] sm:$0xff]  ;;  %v52_v29 = vld [vmem:[%s6270_s0 + $0xd0] sm:$0xff] }
   0xb   :  { %v53_v30 = vld [vmem:[%s6270_s0 + $0xd8] sm:$0xff]  ;;  %v54_v31 = vld [vmem:[%s6270_s0 + $0xe0] sm:$0xff]  ;;  %v55_v32 = vld [vmem:[%s6270_s0 + $0xe8] sm:$0xff] }
   0xc   :  { %v56_v33 = vld [vmem:[%s6270_s0 + $0xf0] sm:$0xff]  ;;  %v57_v34 = vld [vmem:[%s6270_s0 + $0xf8] sm:$0xff]  ;;  %v1756_v37 = vld [vmem:[%s6271_s3 + $0x28] sm:$0xff] }
   0xd   :  { %3582 = vmatmul.mubr.msk.f32.gmra.mxu0 %vm540_vm1, %v4037_v8  ;;  %3632 = vmatmul.mubr.msk.f32.gmra.mxu1 %vm540_vm1, %v4037_v8  ;;  %v1758_v35 = vld [vmem:[%s6271_s3 + $0x38] sm:$0xff]  ;;  %v1757_v36 = vld [vmem:[%s6271_s3 + $0x30] sm:$0xff]  ;;  %v1755_v38 = vld [vmem:[%s6271_s3 + $0x20] sm:$0xff] }
   0xe   :  { %3584 = vmatprep.mubr.msk.f32.mxu0 %vm540_vm1, %v4042_v9  ;;  %3634 = vmatprep.mubr.msk.f32.mxu1 %vm540_vm1, %v4042_v9  ;;  %v1754_v39 = vld [vmem:[%s6271_s3 + $0x18] sm:$0xff]  ;;  %v1753_v40 = vld [vmem:[%s6271_s3 + $0x10] sm:$0xff]  ;;  %v1752_v42 = vld [vmem:[%s6271_s3 + $0x8] sm:$0xff] }
   0xf   :  { %3723 = vmatprep.subr.mxu1 %v1758_v35  ;;  %v3275_v41 = vld [vmem:[%s6271_s3 + $0xb8] sm:$0xff]  ;;  %v3274_v43 = vld [vmem:[%s6271_s3 + $0xb0] sm:$0xff]  ;;  %v3273_v44 = vld [vmem:[%s6271_s3 + $0xa8] sm:$0xff] }
  0x10   :  { %3724 = vmatpush3.msra.mxu1 %v1758_v35  ;;  %3787 = vmatprep.subr.mxu0 %v3275_v41  ;;  %v3272_v45 = vld [vmem:[%s6271_s3 + $0xa0] sm:$0xff]  ;;  %v3271_v46 = vld [vmem:[%s6271_s3 + $0x98] sm:$0xff]  ;;  %v3270_v47 = vld [vmem:[%s6271_s3 + $0x90] sm:$0xff] }
  0x11   :  { %3585 = vmatmul.mubr.msk.f32.gmra.mxu0 %vm540_vm1, %v4055_v10  ;;  %3635 = vmatmul.mubr.msk.f32.gmra.mxu1 %vm540_vm1, %v4055_v10  ;;  %v3269_v48 = vld [vmem:[%s6271_s3 + $0x88] sm:$0xff]  ;;  %v1751_v49 = vld [vmem:[%s6271_s3] sm:$0xff]  ;;  %v4357_v51 = vld [vmem:[%s6271_s3 + $0x78] sm:$0xff] }
  0x12   :  { %3587 = vmatprep.mubr.msk.f32.mxu0 %vm540_vm1, %v4060_v11  ;;  %3637 = vmatprep.mubr.msk.f32.mxu1 %vm540_vm1, %v4060_v11  ;;  %v3268_v50 = vld [vmem:[%s6271_s3 + $0x80] sm:$0xff]  ;;  %6418 = vst [vmem:[#allocation2_spill] sm:$0xff] %v4357_v51 }
  0x13   :  { %3725 = vmatprep.subr.mxu1 %v1757_v36 }
  0x14   :  { %3726 = vmatpush3.msra.mxu1 %v1757_v36 }
  0x15   :  { %3588 = vmatmul.mubr.msk.f32.gmra.mxu0 %vm540_vm1, %v4073_v12  ;;  %3638 = vmatmul.mubr.msk.f32.gmra.mxu1 %vm540_vm1, %v4073_v12 }
  0x16   :  { %3590 = vmatprep.mubr.msk.f32.mxu0 %vm540_vm1, %v4078_v13  ;;  %3640 = vmatprep.mubr.msk.f32.mxu1 %vm540_vm1, %v4078_v13 }
  0x17   :  { %3727 = vmatprep.subr.mxu1 %v1756_v37 }
  0x18   :  { %3728 = vmatpush3.msra.mxu1 %v1756_v37 }
  0x19   :  { %3591 = vmatmul.mubr.msk.f32.gmra.mxu0 %vm540_vm1, %v4091_v14  ;;  %3641 = vmatmul.mubr.msk.f32.gmra.mxu1 %vm540_vm1, %v4091_v14 }
  0x1a   :  { %3593 = vmatprep.mubr.msk.f32.mxu0 %vm540_vm1, %v4096_v15  ;;  %3643 = vmatprep.mubr.msk.f32.mxu1 %vm540_vm1, %v4096_v15 }
  0x1b   :  { %3729 = vmatprep.subr.mxu1 %v1755_v38 }
  0x1c   :  { %3730 = vmatpush3.msra.mxu1 %v1755_v38 }
  0x1d   :  { %3594 = vmatmul.mubr.msk.f32.gmra.mxu0 %vm540_vm1, %v4109_v16  ;;  %3644 = vmatmul.mubr.msk.f32.gmra.mxu1 %vm540_vm1, %v4109_v16 }
  0x1e   :  { %3596 = vmatprep.mubr.msk.f32.mxu0 %vm540_vm1, %v4114_v17  ;;  %3646 = vmatprep.mubr.msk.f32.mxu1 %vm540_vm1, %v4114_v17 }
  0x1f   :  { %3731 = vmatprep.subr.mxu1 %v1754_v39 }
  0x20   :  { %3732 = vmatpush3.msra.mxu1 %v1754_v39 }
  0x21   :  { %3597 = vmatmul.mubr.msk.f32.gmra.mxu0 %vm540_vm1, %v4127_v18  ;;  %3647 = vmatmul.mubr.msk.f32.gmra.mxu1 %vm540_vm1, %v4127_v18 }
  0x22   :  { %3599 = vmatprep.mubr.msk.f32.mxu0 %vm540_vm1, %v4132_v19  ;;  %3649 = vmatprep.mubr.msk.f32.mxu1 %vm540_vm1, %v4132_v19 }
  0x23   :  { %3733 = vmatprep.subr.mxu1 %v1753_v40 }
  0x24   :  { %3734 = vmatpush3.msra.mxu1 %v1753_v40 }
  0x25   :  { %3600 = vmatmul.mubr.msk.f32.gmra.mxu0 %vm540_vm1, %v4145_v20  ;;  %3650 = vmatmul.mubr.msk.f32.gmra.mxu1 %vm540_vm1, %v4145_v20 }
  0x26   :  { %3602 = vmatprep.mubr.msk.f32.mxu0 %vm540_vm1, %v4150_v21  ;;  %3652 = vmatprep.mubr.msk.f32.mxu1 %vm540_vm1, %v4150_v21 }
  0x27   :  { %3735 = vmatprep.subr.mxu1 %v1752_v42 }
  0x28   :  { %3736 = vmatpush3.msra.mxu1 %v1752_v42 }
  0x29   :  { %3603 = vmatmul.mubr.msk.f32.gmra.mxu0 %vm540_vm1, %v4163_v22  ;;  %3653 = vmatmul.mubr.msk.f32.gmra.mxu1 %vm540_vm1, %v4163_v22 }
  0x2a   :  { %3605 = vmatprep.mubr.msk.f32.mxu0 %vm540_vm1, %v4168_v23  ;;  %3655 = vmatprep.mubr.msk.f32.mxu1 %vm540_vm1, %v4168_v23 }
  0x2b   :  { %3737 = vmatprep.subr.mxu1 %v1751_v49 }
  0x2c   :  { %3738 = vmatpush3.msra.mxu1 %v1751_v49 }
  0x2d   :  { %3606 = vmatmul.mubr.msk.f32.gmra.mxu0 %vm540_vm1, %v4181_v24  ;;  %3656 = vmatmul.mubr.msk.f32.gmra.mxu1 %vm540_vm1, %v4181_v24 }
  0x2e   :  { %3608 = vmatprep.mubr.msk.f32.mxu0 %vm540_vm1, %v4186_v25  ;;  %3658 = vmatprep.mubr.msk.f32.mxu1 %vm540_vm1, %v4186_v25 }
  0x2f   :  { %3851 = vmatprep.subr.mxu1 %v4357_v51 }
  0x31   :  { %3609 = vmatmul.mubr.msk.f32.gmra.mxu0 %vm540_vm1, %v4199_v26  ;;  %3659 = vmatmul.mubr.msk.f32.gmra.mxu1 %vm540_vm1, %v4199_v26 }
  0x32   :  { %3611 = vmatprep.mubr.msk.f32.mxu0 %vm540_vm1, %v4204_v27  ;;  %3661 = vmatprep.mubr.msk.f32.mxu1 %vm540_vm1, %v4204_v27 }
  0x35   :  { %3612 = vmatmul.mubr.msk.f32.gmra.mxu0 %vm540_vm1, %v51_v28  ;;  %3662 = vmatmul.mubr.msk.f32.gmra.mxu1 %vm540_vm1, %v51_v28 }
  0x36   :  { %3614 = vmatprep.mubr.msk.f32.mxu0 %vm540_vm1, %v52_v29  ;;  %3664 = vmatprep.mubr.msk.f32.mxu1 %vm540_vm1, %v52_v29 }
  0x39   :  { %3615 = vmatmul.mubr.msk.f32.gmra.mxu0 %vm540_vm1, %v53_v30  ;;  %3665 = vmatmul.mubr.msk.f32.gmra.mxu1 %vm540_vm1, %v53_v30 }
  0x3a   :  { %3617 = vmatprep.mubr.msk.f32.mxu0 %vm540_vm1, %v54_v31  ;;  %3667 = vmatprep.mubr.msk.f32.mxu1 %vm540_vm1, %v54_v31 }
  0x3d   :  { %3618 = vmatmul.mubr.msk.f32.gmra.mxu0 %vm540_vm1, %v55_v32  ;;  %3668 = vmatmul.mubr.msk.f32.gmra.mxu1 %vm540_vm1, %v55_v32 }
  0x3e   :  { %3620 = vmatprep.mubr.msk.f32.mxu0 %vm540_vm1, %v56_v33  ;;  %3670 = vmatprep.mubr.msk.f32.mxu1 %vm540_vm1, %v56_v33 }
  0x41   :  { %3621 = vmatmul.mubr.msk.f32.gmra.mxu0 %vm540_vm1, %v57_v34  ;;  %3671 = vmatmul.mubr.msk.f32.gmra.mxu1 %vm540_vm1, %v57_v34 }
  0x42   :  { %3675 = vmatprep.mubr.msk.f32.mxu0 %vm540_vm1, %v3983_v2 }
  0x45   :  { %3676 = vmatmul.mubr.msk.f32.vlgmr.msra.gmra.mxu0 %vm540_vm1, %v3990_v3 }
  0x46   :  { %3678 = vmatprep.mubr.msk.f32.mxu0 %vm540_vm1, %v4001_v5  ;;  %3788 = vmatpush3.msra.mxu0 %v3275_v41 }
  0x47   :  { %3789 = vmatprep.subr.mxu0 %v3274_v43 }
  0x48   :  { %3790 = vmatpush3.msra.mxu0 %v3274_v43 }
  0x49   :  { %3679 = vmatmul.mubr.msk.f32.gmra.mxu0 %vm540_vm1, %v4016_v6  ;;  %3791 = vmatprep.subr.mxu0 %v3273_v44 }
  0x4a   :  { %3681 = vmatprep.mubr.msk.f32.mxu0 %vm540_vm1, %v4024_v7  ;;  %3792 = vmatpush3.msra.mxu0 %v3273_v44 }
  0x4b   :  { %3793 = vmatprep.subr.mxu0 %v3272_v45 }
  0x4c   :  { %3794 = vmatpush3.msra.mxu0 %v3272_v45 }
  0x4d   :  { %3682 = vmatmul.mubr.msk.f32.gmra.mxu0 %vm540_vm1, %v4037_v8  ;;  %3795 = vmatprep.subr.mxu0 %v3271_v46 }
  0x4e   :  { %3684 = vmatprep.mubr.msk.f32.mxu0 %vm540_vm1, %v4042_v9  ;;  %3796 = vmatpush3.msra.mxu0 %v3271_v46 }
  0x4f   :  { %3797 = vmatprep.subr.mxu0 %v3270_v47 }
  0x50   :  { %3798 = vmatpush3.msra.mxu0 %v3270_v47 }
  0x51   :  { %3685 = vmatmul.mubr.msk.f32.gmra.mxu0 %vm540_vm1, %v4055_v10  ;;  %3799 = vmatprep.subr.mxu0 %v3269_v48 }
  0x52   :  { %3687 = vmatprep.mubr.msk.f32.mxu0 %vm540_vm1, %v4060_v11  ;;  %3800 = vmatpush3.msra.mxu0 %v3269_v48 }
  0x53   :  { %3801 = vmatprep.subr.mxu0 %v3268_v50 }
  0x54   :  { %3802 = vmatpush3.msra.mxu0 %v3268_v50 }
  0x55   :  { %3688 = vmatmul.mubr.msk.f32.gmra.mxu0 %vm540_vm1, %v4073_v12 }
  0x56   :  { %3690 = vmatprep.mubr.msk.f32.mxu0 %vm540_vm1, %v4078_v13 }
  0x59   :  { %3691 = vmatmul.mubr.msk.f32.gmra.mxu0 %vm540_vm1, %v4091_v14 }
  0x5a   :  { %3693 = vmatprep.mubr.msk.f32.mxu0 %vm540_vm1, %v4096_v15  ;;  %v58_v15 = vlaneseq }
  0x5d   :  { %3694 = vmatmul.mubr.msk.f32.gmra.mxu0 %vm540_vm1, %v4109_v16 }
  0x5e   :  { %3696 = vmatprep.mubr.msk.f32.mxu0 %vm540_vm1, %v4114_v17 }
  0x61   :  { %3697 = vmatmul.mubr.msk.f32.gmra.mxu0 %vm540_vm1, %v4127_v18 }
  0x62   :  { %3699 = vmatprep.mubr.msk.f32.mxu0 %vm540_vm1, %v4132_v19  ;;  %v4420_v19 = vshrl.u32 %v58_v15, 7 }
  0x64   :  { %6423 = vst [vmem:[#allocation7_spill] sm:$0xff] %v4420_v19  ;;  %v4458_v36 = vadd.s32 144, %v4420_v19  ;;  %v4461_v37 = vadd.s32 160, %v4420_v19  ;;  %v4466_v40 = vadd.s32 176, %v4420_v19  ;;  %v4469_v41 = vadd.s32 192, %v4420_v19 }
  0x65   :  { %3700 = vmatmul.mubr.msk.f32.gmra.mxu0 %vm540_vm1, %v4145_v20  ;;  %v4476_v45 = vadd.s32 208, %v4420_v19  ;;  %v4479_v46 = vadd.s32 224, %v4420_v19  ;;  %v62_v48 = vadd.s32 24, %v4420_v19  ;;  %v4492_v39 = vadd.s32 248, %v4420_v19 }
  0x66   :  { %3702 = vmatprep.mubr.msk.f32.mxu0 %vm540_vm1, %v4150_v21  ;;  %6429 = vst [vmem:[#allocation13_spill] sm:$0xff] %v4458_v36  ;;  %6430 = vst [vmem:[#allocation14_spill] sm:$0xff] %v4461_v37  ;;  %v4498_v50 = vadd.s32 240, %v4420_v19  ;;  %vm6309_vm2 = vcmp.lt.s32.totalorder %v4420_v19, 1  ;;  %v4507_v43 = vadd.s32 72, %v4420_v19  ;;  %vm6310_vm3 = vcmp.lt.s32.totalorder %v4420_v19, 7 }
  0x67   :  { %6431 = vst [vmem:[#allocation15_spill] sm:$0xff] %v4466_v40  ;;  %6432 = vst [vmem:[#allocation16_spill] sm:$0xff] %v4469_v41  ;;  %v116_v49 = vand.u32 15, %v62_v48  ;;  %v4515_v41 = vadd.s32 88, %v4420_v19  ;;  %v95_v44 = vand.u32 15, %v4420_v19  ;;  %v6446_v48 = vmov 0 }
  0x68   :  { %6434 = vst [vmem:[#allocation18_spill] sm:$0xff] %v4476_v45  ;;  %6435 = vst [vmem:[#allocation19_spill] sm:$0xff] %v4479_v46  ;;  %v4536_v37 = vadd.s32 136, %v4420_v19  ;;  %v4550_v46 = vadd.s32 184, %v4420_v19  ;;  %v6458_v36 = vmov 0 }
  0x69   :  { %3703 = vmatmul.mubr.msk.f32.gmra.mxu0 %vm540_vm1, %v4163_v22  ;;  %6438 = vst [vmem:[#allocation22_spill] sm:$0xff] %v4492_v39  ;;  %6439 = vst [vmem:[#allocation23_spill] sm:$0xff] %v4498_v50  ;;  %vm4556_vm6 = vcmp.eq.s32.totalorder %v116_v49, 15  ;;  %v4573_v49 = vadd.s32 216, %v4420_v19  ;;  %vm4580_vm8 = vcmp.eq.s32.totalorder %v95_v44, 0  ;;  %v6461_v50 = vmov 0 }
  0x6a   :  { %3705 = vmatprep.mubr.msk.f32.mxu0 %vm540_vm1, %v4168_v23  ;;  %v61_v23 = vadd.s32 16, %v4420_v19  ;;  %v6459_v36 = vsel %vm4580_vm8, 4294967295, %v6458_v36 }
  0x6b   :  { %6460 = vst [vmem:[#allocation34_spill] sm:$0xff] %v6459_v36 }
  0x6c   :  { %v109_v35 = vand.u32 15, %v61_v23 }
  0x6d   :  { %3706 = vmatmul.mubr.msk.f32.gmra.mxu0 %vm540_vm1, %v4181_v24  ;;  %v4430_v24 = vadd.s32 32, %v4420_v19 }
  0x6e   :  { %3708 = vmatprep.mubr.msk.f32.mxu0 %vm540_vm1, %v4186_v25  ;;  %v4433_v25 = vadd.s32 48, %v4420_v19  ;;  %vm4531_vm5 = vcmp.eq.s32.totalorder %v109_v35, 0  ;;  %v4547_v35 = vadd.s32 168, %v4420_v19 }
  0x6f   :  { %v123_v38 = vand.u32 15, %v4430_v24  ;;  %v6447_v48 = vsel %vm4531_vm5, 4294967295, %v6446_v48 }
  0x70   :  { %6448 = vst [vmem:[#allocation28_spill] sm:$0xff] %v6447_v48 }
  0x71   :  { %3709 = vmatmul.mubr.msk.f32.gmra.mxu0 %vm540_vm1, %v4199_v26  ;;  %vm4560_vm7 = vcmp.eq.s32.totalorder %v123_v38, 0 }
  0x72   :  { %3711 = vmatprep.mubr.msk.f32.mxu0 %vm540_vm1, %v4204_v27  ;;  %v4438_v27 = vadd.s32 64, %v4420_v19 }
  0x75   :  { %3712 = vmatmul.mubr.msk.f32.gmra.mxu0 %vm540_vm1, %v51_v28  ;;  %v4441_v28 = vadd.s32 80, %v4420_v19 }
  0x76   :  { %3714 = vmatprep.mubr.msk.f32.mxu0 %vm540_vm1, %v52_v29 }
  0x79   :  { %3715 = vmatmul.mubr.msk.f32.gmra.mxu0 %vm540_vm1, %v53_v30  ;;  %v4446_v30 = vadd.s32 96, %v4420_v19 }
  0x7a   :  { %3717 = vmatprep.mubr.msk.f32.mxu0 %vm540_vm1, %v54_v31  ;;  %v4449_v31 = vadd.s32 112, %v4420_v19 }
  0x7d   :  { %3718 = vmatmul.mubr.msk.f32.gmra.mxu0 %vm540_vm1, %v55_v32  ;;  %v4452_v32 = vadd.s32 128, %v4420_v19 }
  0x7e   :  { %3720 = vmatprep.mubr.msk.f32.mxu0 %vm540_vm1, %v56_v33 }
  0x7f   :  { %6427 = vst [vmem:[#allocation11_spill] sm:$0xff] %v4452_v32 }
  0x81   :  { %3721 = vmatmul.mubr.msk.f32.gmra.mxu0 %vm540_vm1, %v57_v34  ;;  %v60_v34 = vadd.s32 8, %v4420_v19 }
  0x83   :  { %v102_v24 = vand.u32 15, %v60_v34  ;;  %v4504_v34 = vadd.s32 56, %v4420_v19 }
  0x85   :  { %vm4522_vm4 = vcmp.eq.s32.totalorder %v102_v24, 15  ;;  %v4539_v24 = vadd.s32 152, %v4420_v19 }
  0xc5   :  { %v4360_v52 = vpop.f32.mrf.mxu0  ;;  %v4362_v53 = vpop.f32.mrf.mxu1 }
  0xc6   :  { %v1099_v32 = vrot.slane %v4360_v52, 7  ;;  %v6465_v52 = vand.u32 15, %v4433_v25 }
  0xc7   :  { %v4364_v54 = vpop.f32.mrf.mxu0  ;;  %v4366_v55 = vpop.f32.mrf.mxu1 }
  0xc8   :  { %6419 = vst [vmem:[#allocation3_spill] sm:$0xff] %v4366_v55  ;;  %v1098_v38 = vrot.slane %v4364_v54, 7  ;;  %vm4605_vm10 = vcmp.eq.s32.totalorder %v6465_v52, 0 }
  0xc9   :  { %v4368_v56 = vpop.f32.mrf.mxu0  ;;  %v4370_v57 = vpop.f32.mrf.mxu1 }
  0xca   :  { %v1262_v44 = vrot.slane %v4370_v57, 1  ;;  %v1101_v54 = vrot.slane %v4368_v56, 7  ;;  %v1161_v25 = vsel %vm6309_vm2, %v1098_v38, %v1099_v32  ;;  %v6470_v56 = vmov 0 }
  0xcb   :  { %v4372_v58 = vpop.f32.mrf.mxu0  ;;  %v4374_v59 = vpop.f32.mrf.mxu1  ;;  %v6473_v57 = vand.u32 15, %v4438_v27 }
  0xcc   :  { %v1261_v39 = vrot.slane %v4374_v59, 1  ;;  %v4570_v59 = vadd.s32 200, %v4420_v19 }
  0xcd   :  { %v4376_v60 = vpop.f32.mrf.mxu0  ;;  %v4378_v61 = vpop.f32.mrf.mxu1  ;;  %vm4629_vm12 = vcmp.eq.s32.totalorder %v6473_v57, 0 }
  0xcf   :  { %v4380_v62 = vpop.f32.mrf.mxu0  ;;  %v4382_v63 = vpop.f32.mrf.mxu1 }
  0xd1   :  { %v4384_v0 = vpop.f32.mrf.mxu0  ;;  %v4386_v1 = vpop.f32.mrf.mxu1 }
  0xd3   :  { %v4388_v2 = vpop.f32.mrf.mxu0  ;;  %v4392_v4 = vpop.f32.mrf.mxu1 }
  0xd4   :  { %v1104_v27 = vrot.slane %v4388_v2, 7 }
  0xd5   :  { %v4390_v3 = vpop.f32.mrf.mxu0  ;;  %v4398_v7 = vpop.f32.mrf.mxu1 }
  0xd7   :  { %v4394_v5 = vpop.f32.mrf.mxu0  ;;  %v4404_v10 = vpop.f32.mrf.mxu1 }
  0xd9   :  { %v4396_v6 = vpop.f32.mrf.mxu0  ;;  %v4410_v13 = vpop.f32.mrf.mxu1 }
  0xdb   :  { %v4400_v8 = vpop.f32.mrf.mxu0  ;;  %v4416_v17 = vpop.f32.mrf.mxu1 }
  0xdd   :  { %v4402_v9 = vpop.f32.mrf.mxu0  ;;  %v4424_v21 = vpop.f32.mrf.mxu1 }
  0xdf   :  { %v4406_v11 = vpop.f32.mrf.mxu0  ;;  %v4443_v29 = vpop.f32.mrf.mxu1 }
  0xe1   :  { %v4408_v12 = vpop.f32.mrf.mxu0  ;;  %v4481_v47 = vpop.f32.mrf.mxu1 }
  0xe2   :  { %6420 = vst [vmem:[#allocation4_spill] sm:$0xff] %v4408_v12  ;;  %6436 = vst [vmem:[#allocation20_spill] sm:$0xff] %v4481_v47  ;;  %v1263_v12 = vrot.slane %v4382_v63, 1  ;;  %v1264_v47 = vrot.slane %v4378_v61, 1  ;;  %v1103_v61 = vrot.slane %v4376_v60, 7 }
  0xe3   :  { %v4412_v14 = vpop.f32.mrf.mxu0 }
  0xe4   :  { %v1319_v60 = vsel %vm6310_vm3, %v1262_v44, %v1263_v12 }
  0xe5   :  { %v4414_v16 = vpop.f32.mrf.mxu0 }
  0xe6   :  { %6421 = vst [vmem:[#allocation5_spill] sm:$0xff] %v4414_v16 }
  0xe7   :  { %v4418_v18 = vpop.f32.mrf.mxu0 }
  0xe8   :  { %6422 = vst [vmem:[#allocation6_spill] sm:$0xff] %v4418_v18  ;;  %v1100_v18 = vrot.slane %v4372_v58, 7 }
  0xe9   :  { %v4422_v20 = vpop.f32.mrf.mxu0 }
  0xea   :  { %6424 = vst [vmem:[#allocation8_spill] sm:$0xff] %v4422_v20  ;;  %v144_v20 = vand.u32 15, %v4504_v34  ;;  %v6453_v34 = vmov 0  ;;  %v4621_v52 = vsel %vm6309_vm2, %v1099_v32, %v1100_v18  ;;  %v6477_v32 = vrot.slane %v4366_v55, 1 }
  0xeb   :  { %v4426_v22 = vpop.f32.mrf.mxu0  ;;  %v6454_v34 = vsel %vm4560_vm7, 4294967295, %v6453_v34  ;;  %v1229_v2 = vsel %vm4531_vm5, 0.0, %v4621_v52  ;;  %v1267_v55 = vrot.slane %v4404_v10, 1  ;;  %v1391_v52 = vsel %vm4556_vm6, 0.0, %v1319_v60 }
  0xec   :  { %6425 = vst [vmem:[#allocation9_spill] sm:$0xff] %v4426_v22  ;;  %6455 = vst [vmem:[#allocation31_spill] sm:$0xff] %v6454_v34  ;;  %vm4623_vm11 = vcmp.eq.s32.totalorder %v144_v20, 15  ;;  %v4682_v10 = vsel %vm6310_vm3, %v1263_v12, %v1264_v47  ;;  %v1107_v60 = vrot.slane %v4390_v3, 7  ;;  %v6484_v12 = vand.u32 15, %v4441_v28 }
  0xed   :  { %v4435_v26 = vpop.f32.mrf.mxu0  ;;  %v6471_v56 = vsel %vm4623_vm11, 4294967295, %v6470_v56 }
  0xee   :  { %6426 = vst [vmem:[#allocation10_spill] sm:$0xff] %v4435_v26  ;;  %v6442_v26 = vmov 0  ;;  %6472 = vst [vmem:[#allocation39_spill] sm:$0xff] %v6471_v56  ;;  %vm4700_vm15 = vcmp.eq.s32.totalorder %v6484_v12, 0  ;;  %v6493_v12 = vmov 0 }
  0xef   :  { %v4454_v33 = vpop.f32.mrf.mxu0  ;;  %v6443_v26 = vsel %vm4522_vm4, 4294967295, %v6442_v26 }
  0xf0   :  { %6428 = vst [vmem:[#allocation12_spill] sm:$0xff] %v4454_v33  ;;  %v4511_v33 = vpop.f32.mrf.mxu1  ;;  %6444 = vst [vmem:[#allocation26_spill] sm:$0xff] %v6443_v26  ;;  %v1105_v26 = vrot.slane %v4384_v0, 7 }
  0xf1   :  { %v4471_v42 = vpop.f32.mrf.mxu0 }
  0xf2   :  { %6433 = vst [vmem:[#allocation17_spill] sm:$0xff] %v4471_v42  ;;  %v64_v42 = vadd.s32 40, %v4420_v19  ;;  %v4554_v16 = vpop.f32.mrf.mxu1 }
  0xf3   :  { %v4487_v23 = vpop.f32.mrf.mxu0  ;;  %6450 = vst [vmem:[#allocation30_spill] sm:$0xff] %v4554_v16  ;;  %v4576_v16 = vadd.s32 232, %v4420_v19 }
  0xf4   :  { %6437 = vst [vmem:[#allocation21_spill] sm:$0xff] %v4487_v23  ;;  %v4528_v23 = vadd.s32 120, %v4420_v19  ;;  %v130_v45 = vand.u32 15, %v64_v42  ;;  %v1260_v42 = vrot.slane %v4362_v53, 1  ;;  %v4599_v51 = vpop.f32.mrf.mxu1  ;;  %v6466_v53 = vmov 0 }
  0xf5   :  { %v4500_v15 = vpop.f32.mrf.mxu0  ;;  %6457 = vst [vmem:[#allocation33_spill] sm:$0xff] %v4576_v16  ;;  %v6467_v53 = vsel %vm4605_vm10, 4294967295, %v6466_v53  ;;  %v1159_v16 = vsel %vm6309_vm2, %v1100_v18, %v1101_v54  ;;  %v1320_v18 = vsel %vm6310_vm3, %v1261_v39, %v1262_v44  ;;  %v6481_v44 = vmov 0 }
  0xf6   :  { %6440 = vst [vmem:[#allocation24_spill] sm:$0xff] %v4500_v15  ;;  %v4518_v15 = vadd.s32 104, %v4420_v19  ;;  %6445 = vst [vmem:[#allocation27_spill] sm:$0xff] %v4528_v23  ;;  %vm4584_vm9 = vcmp.eq.s32.totalorder %v130_v45, 15  ;;  %v1102_v45 = vrot.slane %v4380_v62, 7  ;;  %v6474_v62 = vmov 0  ;;  %v4645_v57 = vpop.f32.mrf.mxu1 }
  0xf7   :  { %v4520_v40 = vpop.f32.mrf.mxu0  ;;  %v6462_v50 = vsel %vm4584_vm9, 4294967295, %v6461_v50  ;;  %6468 = vst [vmem:[#allocation37_spill] sm:$0xff] %v6467_v53  ;;  %v6475_v62 = vsel %vm4629_vm12, 4294967295, %v6474_v62  ;;  %v1322_v20 = vsel %vm6310_vm3, %v6477_v32, %v1260_v42 }
  0xf8   :  { %6441 = vst [vmem:[#allocation25_spill] sm:$0xff] %v4520_v40  ;;  %6463 = vst [vmem:[#allocation35_spill] sm:$0xff] %v6462_v50 }
  0xf9   :  { %v4542_v22 = vpop.f32.mrf.mxu0  ;;  %6476 = vst [vmem:[#allocation40_spill] sm:$0xff] %v6475_v62  ;;  %v6565_v62 = vld [vmem:[#allocation14_spill] sm:$0xff] }
  0xfa   :  { %6449 = vst [vmem:[#allocation29_spill] sm:$0xff] %v4542_v22 }
  0xfb   :  { %v4566_v22 = vpop.f32.mrf.mxu0 }
  0xfc   :  { %6456 = vst [vmem:[#allocation32_spill] sm:$0xff] %v4566_v22  ;;  %v1321_v22 = vsel %vm6310_vm3, %v1260_v42, %v1261_v39  ;;  %v1266_v42 = vrot.slane %v4386_v1, 1  ;;  %v1157_v39 = vsel %vm6309_vm2, %v1102_v45, %v1103_v61 }
  0xfd   :  { %v4592_v23 = vpop.f32.mrf.mxu0  ;;  %v1389_v63 = vsel %vm4522_vm4, 0.0, %v1321_v22  ;;  %v4652_v22 = vsel %vm6309_vm2, %v1101_v54, %v1102_v45  ;;  %v4692_v45 = vpop.f32.mrf.mxu1 }
  0xfe   :  { %6464 = vst [vmem:[#allocation36_spill] sm:$0xff] %v4592_v23  ;;  %v1265_v23 = vrot.slane %v4392_v4, 1 }
  0xff   :  { %v4610_v58 = vpop.f32.mrf.mxu0 }
 0x100   :  { %6469 = vst [vmem:[#allocation38_spill] sm:$0xff] %v4610_v58  ;;  %v1106_v58 = vrot.slane %v4394_v5, 7  ;;  %v4671_v1 = vsel %vm6310_vm3, %v1264_v47, %v1265_v23  ;;  %v1231_v5 = vsel %vm4560_vm7, 0.0, %v4652_v22  ;;  %v4696_v22 = vsel %vm6309_vm2, %v1103_v61, %v1104_v27  ;;  %v4720_v61 = vld [vmem:[%s6272_s2] ss:$0 sm:$0xff] }
 0x101   :  { %v4634_v4 = vpop.f32.mrf.mxu0  ;;  %v6485_v47 = vmov 0  ;;  %v1393_v3 = vsel %vm4584_vm9, 0.0, %v4671_v1 }
 0x102   :  { %v6479_v54 = vrot.slane %v4634_v4, 7  ;;  %v6486_v47 = vsel %vm4700_vm15, 4294967295, %v6485_v47  ;;  %v4728_v1 = vsel %vm6309_vm2, %v1105_v26, %v1106_v58 }
 0x103   :  { %v4656_v32 = vpop.f32.mrf.mxu0  ;;  %6487 = vst [vmem:[#allocation43_spill] sm:$0xff] %v6486_v47  ;;  %v6562_v47 = vmov 0 }
 0x104   :  { %6478 = vst [vmem:[#allocation41_spill] sm:$0xff] %v4656_v32  ;;  %v1162_v0 = vsel %vm6309_vm2, %v6479_v54, %v1098_v38  ;;  %v6480_v38 = vand.u32 15, %v4507_v43  ;;  %v1268_v54 = vrot.slane %v4398_v7, 1  ;;  %v4711_v7 = vsel %vm6309_vm2, %v1104_v27, %v1105_v26 }
 0x105   :  { %v3677_v32 = vpop.f32.mrf.mxu0  ;;  %v1227_v43 = vsel %vm4580_vm8, 0.0, %v1162_v0  ;;  %v4724_v0 = vsel %vm6310_vm3, %v1266_v42, %v1267_v55  ;;  %v1109_v27 = vrot.slane %v4396_v6, 7  ;;  %v4741_v26 = vsel %vm6309_vm2, %v1106_v58, %v1107_v60 }
 0x106   :  { %vm4686_vm14 = vcmp.eq.s32.totalorder %v6480_v38, 15  ;;  %v1495_v48 = vadd.f32 %v3677_v32, %v1161_v25  ;;  %v4715_v25 = vsel %vm6310_vm3, %v1265_v23, %v1266_v42  ;;  %v1270_v23 = vrot.slane %v4410_v13, 1 }
 0x107   :  { %v6482_v44 = vsel %vm4686_vm14, 4294967295, %v6481_v44  ;;  %v1489_v38 = vpop.f32.mrf.mxu0  ;;  %v6488_v6 = vand.u32 15, %v4515_v41  ;;  %v6489_v13 = vmov 0  ;;  %v4764_v58 = vsel %vm6310_vm3, %v1267_v55, %v1268_v54 }
 0x108   :  { %6483 = vst [vmem:[#allocation42_spill] sm:$0xff] %v6482_v44  ;;  %v1649_v28 = vadd.f32 %v1495_v48, %v1389_v63  ;;  %v1490_v32 = vadd.f32 %v1489_v38, %v1227_v43  ;;  %v1269_v48 = vrot.slane %v4416_v17, 1  ;;  %v1108_v43 = vrot.slane %v4400_v8, 7  ;;  %v4737_v38 = vpop.f32.mrf.mxu1 }
 0x109   :  { %v3680_v63 = vpop.f32.mrf.mxu0  ;;  %vm4745_vm0 = vcmp.eq.s32.totalorder %v6488_v6, 15  ;;  %v6492_v17 = vand.u32 15, %v4446_v30 }
 0x10a   :  { %v1648_v42 = vadd.f32 %v1490_v32, %v1322_v20  ;;  %v1505_v36 = vadd.f32 %v3680_v63, %v1159_v16  ;;  %v6490_v13 = vsel %vm4745_vm0, 4294967295, %v6489_v13  ;;  %v1688_v8 = vadd.f32 %v4720_v61, %v1649_v28  ;;  %v4775_v34 = vpop.f32.mrf.mxu1 }
 0x10b   :  { %6491 = vst [vmem:[#allocation44_spill] sm:$0xff] %v6490_v13  ;;  %vm4751_vm1 = vcmp.eq.s32.totalorder %v6492_v17, 0  ;;  %v1499_v20 = vpop.f32.mrf.mxu0  ;;  %v1395_v16 = vsel %vm4623_vm11, 0.0, %v4724_v0  ;;  %v1272_v28 = vrot.slane %v4424_v21, 1  ;;  %v1110_v17 = vrot.slane %v4406_v11, 7 }
 0x10c   :  { %v6494_v12 = vsel %vm4751_vm1, 4294967295, %v6493_v12  ;;  %v1687_v32 = vadd.f32 %v4720_v61, %v1648_v42  ;;  %v1651_v63 = vadd.f32 %v1505_v36, %v1391_v52  ;;  %v1500_v6 = vadd.f32 %v1499_v20, %v1229_v2  ;;  %v4834_v20 = vpop.f32.mrf.mxu1 }
 0x10d   :  { %v1271_v0 = vrot.slane %v4443_v29, 1  ;;  %v3683_v56 = vpop.f32.mrf.mxu0  ;;  %v4773_v41 = vsel %vm6310_vm3, %v1268_v54, %v1269_v48  ;;  %v4781_v36 = vsel %vm6309_vm2, %v1107_v60, %v1108_v43  ;;  %v6495_v21 = vand.u32 15, %v4518_v15 }
 0x10e   :  { %v4777_v55 = vmax.f32 %v1687_v32, 0.0  ;;  %v1650_v30 = vadd.f32 %v1500_v6, %v1320_v18  ;;  %v1515_v50 = vadd.f32 %v3683_v56, %v1157_v39  ;;  %v6496_v11 = vmov 0 }
 0x10f   :  { %vm4785_vm13 = vcmp.eq.s32.totalorder %v6495_v21, 15  ;;  %v4789_v29 = vmax.f32 %v1688_v8, 0.0  ;;  %v1690_v2 = vadd.f32 %v4720_v61, %v1651_v63  ;;  %v1509_v52 = vpop.f32.mrf.mxu0  ;;  %v4794_v54 = vsel %vm6309_vm2, %v1108_v43, %v1109_v27  ;;  %v6510_v63 = vld [vmem:[#allocation4_spill] sm:$0xff] }
 0x110   :  { %v6497_v11 = vsel %vm4785_vm13, 4294967295, %v6496_v11  ;;  %v4798_v56 = vsel %vm6310_vm3, %v1269_v48, %v1270_v23  ;;  %v6499_v18 = vand.u32 15, %v4449_v31  ;;  %v6500_v15 = vmov 0  ;;  %v3266_v31 = vld [vmem:[%s6271_s3 + $0x70] sm:$0xff] }
 0x111   :  { %6498 = vst [vmem:[#allocation45_spill] sm:$0xff] %v6497_v11  ;;  %v1689_v39 = vadd.f32 %v4720_v61, %v1650_v30  ;;  %v1653_v60 = vadd.f32 %v1515_v50, %v1393_v3  ;;  %v1510_v42 = vadd.f32 %v1509_v52, %v1231_v5  ;;  %vm6503_vm11 = vcmask 523264   ;;  %v3686_v8 = vpop.f32.mrf.mxu0 }
 0x112   :  { %vm4802_vm8 = vcmp.eq.s32.totalorder %v6499_v18, 0  ;;  %3739 = vmatprep.mubr.msk.f32.mxu1 %vm6503_vm11, %v4777_v55  ;;  %vm6504_vm2 = vmmov %vm6503_vm11  ;;  %v1397_v48 = vsel %vm4686_vm14, 0.0, %v4773_v41  ;;  %v1273_v43 = vrot.slane %v4511_v33, 1  ;;  %vm6507_vm11 = vcmp.lt.s32.totalorder %v4420_v19, 7 }
 0x113   :  { %v6501_v15 = vsel %vm4802_vm8, 4294967295, %v6500_v15  ;;  %3803 = vmatprep.mubr.msk.f32.mxu0 %vm6504_vm2, %v4777_v55  ;;  %vm6505_vm3 = vmmov %vm6504_vm2  ;;  %v4824_v50 = vsel %vm6507_vm11, %v1270_v23, %v1271_v0  ;;  %v1112_v33 = vrot.slane %v4412_v14, 7  ;;  %v4836_v41 = vmax.f32 %v1689_v39, 0.0  ;;  %v6509_v23 = vld [vmem:[#allocation2_spill] sm:$0xff]  ;;  %v6513_v39 = vld [vmem:[#allocation27_spill] sm:$0xff] }
 0x114   :  { %6502 = vst [vmem:[#allocation46_spill] sm:$0xff] %v6501_v15  ;;  %3740 = vmatmul.mubr.msk.f32.vlgmr.msra.gmra.mxu1 %vm6505_vm3, %v4789_v29  ;;  %vm6506_vm7 = vmmov %vm6504_vm2  ;;  %vm6508_vm2 = vcmp.lt.s32.totalorder %v4420_v19, 1  ;;  %v1652_v30 = vadd.f32 %v1510_v42, %v4682_v10  ;;  %v1525_v32 = vadd.f32 %v3686_v8, %v4711_v7  ;;  %v1113_v6 = vrot.slane %v6510_v63, 7  ;;  %v6518_v42 = vld [vmem:[#allocation20_spill] sm:$0xff] }
 0x115   :  { %3804 = vmatmul.mubr.msk.f32.vlgmr.msra.gmra.mxu0 %vm6506_vm7, %v4789_v29  ;;  %v4831_v3 = vsel %vm6508_vm2, %v1109_v27, %v1110_v17  ;;  %3852 = vmatpush3.msra.mxu1 %v6509_v23  ;;  %v4842_v21 = vmax.f32 %v1690_v2, 0.0  ;;  %v1692_v52 = vadd.f32 %v4720_v61, %v1653_v60  ;;  %v1519_v27 = vpop.f32.mrf.mxu0  ;;  %v6511_v14 = vrot.slane %v4402_v9, 7  ;;  %vm6512_vm3 = vmmov %vm6508_vm2 }
 0x116   :  { %3853 = vmatprep.subr.mxu1 %v3266_v31  ;;  %v6514_v10 = vand.u32 15, %v6513_v39  ;;  %v6515_v7 = vmov 0  ;;  %v1274_v8 = vrot.slane %v6518_v42, 1  ;;  %v1691_v2 = vadd.f32 %v4720_v61, %v1652_v30  ;;  %v4894_v42 = vpop.f32.mrf.mxu1 }
 0x117   :  { %v4849_v18 = vsel %vm6512_vm3, %v1110_v17, %v6511_v14  ;;  %v1655_v23 = vadd.f32 %v1525_v32, %v1395_v16  ;;  %v6519_v60 = vsel %vm4605_vm10, 0.0, %v4696_v22  ;;  %vm6520_vm11 = vcmask 523264   ;;  %v3265_v17 = vld [vmem:[%s6271_s3 + $0x68] sm:$0xff]  ;;  %v3689_v16 = vpop.f32.mrf.mxu0  ;;  %3854 = vmatpush3.msra.mxu1 %v3266_v31 }
 0x118   :  { %vm4853_vm7 = vcmp.eq.s32.totalorder %v6514_v10, 15  ;;  %v1520_v63 = vadd.f32 %v1519_v27, %v6519_v60  ;;  %3742 = vmatprep.mubr.msk.f32.mxu1 %vm6520_vm11, %v4836_v41  ;;  %vm6521_vm2 = vmmov %vm6520_vm11  ;;  %v6522_v14 = vld [vmem:[#allocation11_spill] sm:$0xff]  ;;  %v6524_v30 = vmov 0  ;;  %v1399_v22 = vsel %vm4745_vm0, 0.0, %v4824_v50  ;;  %v6533_v27 = vld [vmem:[#allocation6_spill] sm:$0xff]  ;;  %3855 = vmatprep.subr.mxu1 %v3265_v17 }
 0x119   :  { %v6516_v7 = vsel %vm4853_vm7, 4294967295, %v6515_v7  ;;  %3806 = vmatprep.mubr.msk.f32.mxu0 %vm6521_vm2, %v4836_v41  ;;  %v6523_v39 = vand.u32 15, %v6522_v14  ;;  %vm6527_vm14 = vmmov %vm6521_vm2  ;;  %vm6529_vm11 = vcmp.lt.s32.totalorder %v4420_v19, 7  ;;  %v4896_v60 = vmax.f32 %v1691_v2, 0.0  ;;  %v1529_v44 = vpop.f32.mrf.mxu0  ;;  %3856 = vmatpush3.msra.mxu1 %v3265_v17  ;;  %v6552_v17 = vld [vmem:[#allocation8_spill] sm:$0xff] }
 0x11a   :  { %6517 = vst [vmem:[#allocation2_spill] sm:$0xff] %v6516_v7  ;;  %3743 = vmatmul.mubr.msk.f32.gmra.mxu1 %vm6527_vm14, %v4842_v21  ;;  %vm6528_vm10 = vmmov %vm6521_vm2  ;;  %v4885_v32 = vsel %vm6529_vm11, %v1272_v28, %v1273_v43  ;;  %v1654_v14 = vadd.f32 %v1520_v63, %v4715_v25  ;;  %v1535_v50 = vadd.f32 %v3689_v16, %v4741_v26  ;;  %v1114_v13 = vrot.slane %v6533_v27, 7  ;;  %v6534_v25 = vld [vmem:[#allocation5_spill] sm:$0xff] }
 0x11b   :  { %vm4872_vm3 = vcmp.eq.s32.totalorder %v6523_v39, 0  ;;  %3807 = vmatmul.mubr.msk.f32.gmra.mxu0 %vm6528_vm10, %v4842_v21  ;;  %vm6530_vm2 = vmmov %vm6529_vm11  ;;  %v6531_v39 = vrot.slane %v4402_v9, 7  ;;  %vm6532_vm10 = vcmp.lt.s32.totalorder %v4420_v19, 1  ;;  %v1694_v2 = vadd.f32 %v4720_v61, %v1655_v23  ;;  %3745 = vmatprep.mubr.msk.f32.mxu1 %vm6527_vm14, %v4896_v60  ;;  %v3692_v27 = vpop.f32.mrf.mxu0 }
 0x11c   :  { %v6525_v30 = vsel %vm4872_vm3, 4294967295, %v6524_v30  ;;  %v4892_v10 = vsel %vm6530_vm2, %v1271_v0, %v1272_v28  ;;  %v1275_v28 = vrot.slane %v4599_v51, 1  ;;  %v4908_v0 = vmax.f32 %v1692_v52, 0.0  ;;  %vm6536_vm11 = vmmov %vm6527_vm14  ;;  %v3264_v51 = vld [vmem:[%s6271_s3 + $0x60] sm:$0xff] }
 0x11d   :  { %6526 = vst [vmem:[#allocation4_spill] sm:$0xff] %v6525_v30  ;;  %v4904_v5 = vsel %vm6532_vm10, %v6531_v39, %v1112_v33  ;;  %v1693_v26 = vadd.f32 %v4720_v61, %v1654_v14  ;;  %v1657_v31 = vadd.f32 %v1535_v50, %v1397_v48  ;;  %v6535_v9 = vsel %vm4629_vm12, 0.0, %v4728_v1  ;;  %3809 = vmatprep.mubr.msk.f32.mxu0 %vm6536_vm11, %v4896_v60  ;;  %v6537_v52 = vld [vmem:[#allocation30_spill] sm:$0xff]  ;;  %vm6538_vm2 = vmmov %vm6536_vm11  ;;  %v4944_v39 = vpop.f32.mrf.mxu1  ;;  %v1539_v11 = vpop.f32.mrf.mxu0 }
 0x11e   :  { %v1530_v16 = vadd.f32 %v1529_v44, %v6535_v9  ;;  %v1276_v23 = vrot.slane %v6537_v52, 1  ;;  %3746 = vmatmul.mubr.msk.f32.gmra.mxu1 %vm6538_vm2, %v4908_v0  ;;  %vm6539_vm10 = vmmov %vm6538_vm2  ;;  %v1401_v44 = vsel %vm4785_vm13, 0.0, %v4885_v32  ;;  %vm6540_vm14 = vcmp.lt.s32.totalorder %v4420_v19, 1  ;;  %3857 = vmatprep.subr.mxu1 %v3264_v51 }
 0x11f   :  { %3810 = vmatmul.mubr.msk.f32.gmra.mxu0 %vm6539_vm10, %v4908_v0  ;;  %v1147_v1 = vsel %vm6540_vm14, %v1112_v33, %v1113_v6  ;;  %vm6541_vm11 = vcmp.lt.s32.totalorder %v4420_v19, 7  ;;  %v6542_v14 = vand.u32 15, %v4536_v37  ;;  %v6543_v50 = vmov 0  ;;  %v6546_v33 = vld [vmem:[#allocation13_spill] sm:$0xff]  ;;  %3858 = vmatpush3.msra.mxu1 %v3264_v51  ;;  %v6571_v51 = vld [vmem:[#allocation10_spill] sm:$0xff] }
 0x120   :  { %v4936_v48 = vsel %vm6541_vm11, %v1273_v43, %v1274_v8  ;;  %v4946_v9 = vmax.f32 %v1693_v26, 0.0  ;;  %v1656_v52 = vadd.f32 %v1530_v16, %v4764_v58  ;;  %v1545_v32 = vadd.f32 %v3692_v27, %v4794_v54  ;;  %vm6551_vm10 = vmmov %vm6541_vm11 }
 0x121   :  { %vm4940_vm0 = vcmp.eq.s32.totalorder %v6542_v14, 15  ;;  %v6547_v63 = vand.u32 15, %v6546_v33  ;;  %v6548_v37 = vmov 0  ;;  %v4959_v14 = vmax.f32 %v1694_v2, 0.0 }
 0x122   :  { %v6544_v50 = vsel %vm4940_vm0, 4294967295, %v6543_v50  ;;  %v1696_v26 = vadd.f32 %v4720_v61, %v1657_v31  ;;  %v1307_v58 = vsel %vm6551_vm10, %v1274_v8, %v1275_v28  ;;  %v4966_v54 = vsel %vm6540_vm14, %v1113_v6, %v1114_v13  ;;  %v3263_v6 = vld [vmem:[%s6271_s3 + $0x58] sm:$0xff] }
 0x123   :  { %6545 = vst [vmem:[#allocation27_spill] sm:$0xff] %v6544_v50  ;;  %vm4955_vm2 = vcmp.eq.s32.totalorder %v6547_v63, 0  ;;  %v1695_v63 = vadd.f32 %v4720_v61, %v1656_v52  ;;  %v1659_v27 = vadd.f32 %v1545_v32, %v1399_v22  ;;  %v6553_v2 = vsel %vm4700_vm15, 0.0, %v4781_v36  ;;  %v6556_v31 = vld [vmem:[#allocation9_spill] sm:$0xff]  ;;  %v3695_v32 = vpop.f32.mrf.mxu0  ;;  %3859 = vmatprep.subr.mxu1 %v3263_v6 }
 0x124   :  { %v6549_v37 = vsel %vm4955_vm2, 4294967295, %v6548_v37  ;;  %v1540_v33 = vadd.f32 %v1539_v11, %v6553_v2  ;;  %vm6554_vm11 = vcmask 523264   ;;  %v1278_v8 = vrot.slane %v4645_v57, 1  ;;  %v4992_v2 = vpop.f32.mrf.mxu1  ;;  %3860 = vmatpush3.msra.mxu1 %v3263_v6 }
 0x125   :  { %6550 = vst [vmem:[#allocation20_spill] sm:$0xff] %v6549_v37  ;;  %3748 = vmatprep.mubr.msk.f32.mxu1 %vm6554_vm11, %v4946_v9  ;;  %vm6555_vm10 = vmmov %vm6554_vm11  ;;  %v1116_v52 = vrot.slane %v6556_v31, 7  ;;  %v1277_v22 = vrot.slane %v4692_v45, 1  ;;  %v6559_v36 = vrot.slane %v6534_v25, 7  ;;  %vm6560_vm11 = vcmp.lt.s32.totalorder %v4420_v19, 1 }
 0x126   :  { %3812 = vmatprep.mubr.msk.f32.mxu0 %vm6555_vm10, %v4946_v9  ;;  %vm6557_vm14 = vmmov %vm6555_vm10  ;;  %v4994_v43 = vmax.f32 %v1695_v63, 0.0  ;;  %v1658_v57 = vadd.f32 %v1540_v33, %v4798_v56  ;;  %v1555_v45 = vadd.f32 %v3695_v32, %v4849_v18  ;;  %v1403_v31 = vsel %vm4853_vm7, 0.0, %v1307_v58  ;;  %v1549_v18 = vpop.f32.mrf.mxu0 }
 0x127   :  { %3749 = vmatmul.mubr.msk.f32.gmra.mxu1 %vm6557_vm14, %v4959_v14  ;;  %vm6558_vm13 = vmmov %vm6555_vm10  ;;  %v1145_v11 = vsel %vm6560_vm11, %v1114_v13, %v6559_v36  ;;  %v6561_v16 = vand.u32 15, %v4539_v24  ;;  %v6566_v13 = vand.u32 15, %v6565_v62  ;;  %v6567_v36 = vmov 0 }
 0x128   :  { %3813 = vmatmul.mubr.msk.f32.gmra.mxu0 %vm6558_vm13, %v4959_v14  ;;  %v5012_v63 = vmax.f32 %v1696_v26, 0.0  ;;  %v1698_v56 = vadd.f32 %v4720_v61, %v1659_v27  ;;  %v1243_v24 = vsel %vm4872_vm3, 0.0, %v4966_v54  ;;  %vm6570_vm14 = vcmp.lt.s32.totalorder %v4420_v19, 7 }
 0x129   :  { %vm5002_vm10 = vcmp.eq.s32.totalorder %v6561_v16, 15  ;;  %vm5008_vm13 = vcmp.eq.s32.totalorder %v6566_v13, 0  ;;  %v5020_v58 = vsel %vm6570_vm14, %v1275_v28, %v1276_v23  ;;  %v1697_v16 = vadd.f32 %v4720_v61, %v1658_v57  ;;  %v3262_v28 = vld [vmem:[%s6271_s3 + $0x50] sm:$0xff] }
 0x12a   :  { %v6563_v47 = vsel %vm5002_vm10, 4294967295, %v6562_v47  ;;  %v6568_v36 = vsel %vm5008_vm13, 4294967295, %v6567_v36  ;;  %v1661_v33 = vadd.f32 %v1555_v45, %v1401_v44  ;;  %v6572_v26 = vsel %vm4751_vm1, 0.0, %v4831_v3  ;;  %v3698_v44 = vpop.f32.mrf.mxu0  ;;  %v6580_v13 = vld [vmem:[#allocation12_spill] sm:$0xff]  ;;  %3861 = vmatprep.subr.mxu1 %v3262_v28 }
 0x12b   :  { %6564 = vst [vmem:[#allocation11_spill] sm:$0xff] %v6563_v47  ;;  %6569 = vst [vmem:[#allocation6_spill] sm:$0xff] %v6568_v36  ;;  %v1550_v27 = vadd.f32 %v1549_v18, %v6572_v26  ;;  %vm6573_vm11 = vcmask 523264   ;;  %v1280_v54 = vrot.slane %v4737_v38, 1  ;;  %v1279_v32 = vrot.slane %v4775_v34, 1  ;;  %v5050_v18 = vpop.f32.mrf.mxu1  ;;  %3862 = vmatpush3.msra.mxu1 %v3262_v28  ;;  %v3260_v28 = vld [vmem:[%s6271_s3 + $0x40] sm:$0xff] }
 0x12c   :  { %3751 = vmatprep.mubr.msk.f32.mxu1 %vm6573_vm11, %v4994_v43  ;;  %vm6574_vm3 = vmmov %vm6573_vm11  ;;  %vm6577_vm11 = vcmp.lt.s32.totalorder %v4420_v19, 7  ;;  %v6578_v57 = vrot.slane %v6534_v25, 7  ;;  %v1118_v38 = vrot.slane %v6580_v13, 7  ;;  %v5052_v34 = vmax.f32 %v1697_v16, 0.0 }
 0x12d   :  { %3815 = vmatprep.mubr.msk.f32.mxu0 %vm6574_vm3, %v4994_v43  ;;  %vm6575_vm14 = vmmov %vm6574_vm3  ;;  %v1305_v3 = vsel %vm6577_vm11, %v1276_v23, %v1277_v22  ;;  %v1660_v26 = vadd.f32 %v1550_v27, %v4892_v10  ;;  %v1565_v62 = vadd.f32 %v3698_v44, %v1147_v1  ;;  %v6581_v30 = vand.u32 15, %v4547_v35 }
 0x12e   :  { %3752 = vmatmul.mubr.msk.f32.gmra.mxu1 %vm6575_vm14, %v5012_v63  ;;  %vm6576_vm7 = vmmov %vm6574_vm3  ;;  %vm6579_vm3 = vcmp.lt.s32.totalorder %v4420_v19, 1  ;;  %v6582_v7 = vmov 0  ;;  %v5061_v25 = vmax.f32 %v1698_v56, 0.0  ;;  %v1700_v23 = vadd.f32 %v4720_v61, %v1661_v33 }
 0x12f   :  { %3816 = vmatmul.mubr.msk.f32.gmra.mxu0 %vm6576_vm7, %v5012_v63  ;;  %v5047_v45 = vsel %vm6579_vm3, %v6578_v57, %v1116_v52  ;;  %vm5057_vm7 = vcmp.eq.s32.totalorder %v6581_v30, 15  ;;  %v1559_v57 = vpop.f32.mrf.mxu0  ;;  %v6585_v13 = vrot.slane %v6552_v17, 7  ;;  %vm6586_vm14 = vmmov %vm6579_vm3  ;;  %v5070_v10 = vsel %vm6577_vm11, %v1277_v22, %v1278_v8  ;;  %v6590_v22 = vld [vmem:[#allocation15_spill] sm:$0xff] }
 0x130   :  { %v6583_v7 = vsel %vm5057_vm7, 4294967295, %v6582_v7  ;;  %v1699_v35 = vadd.f32 %v4720_v61, %v1660_v26  ;;  %v1663_v30 = vadd.f32 %v1565_v62, %v1403_v31  ;;  %v6587_v1 = vsel %vm4802_vm8, 0.0, %v4904_v5  ;;  %v3261_v5 = vld [vmem:[%s6271_s3 + $0x48] sm:$0xff]  ;;  %v6595_v31 = vld [vmem:[#allocation17_spill] sm:$0xff] }
 0x131   :  { %6584 = vst [vmem:[#allocation5_spill] sm:$0xff] %v6583_v7  ;;  %v1143_v16 = vsel %vm6586_vm14, %v1116_v52, %v6585_v13  ;;  %v1560_v6 = vadd.f32 %v1559_v57, %v6587_v1  ;;  %vm6588_vm3 = vcmask 523264   ;;  %v1405_v52 = vsel %vm4940_vm0, 0.0, %v1305_v3  ;;  %v3701_v44 = vpop.f32.mrf.mxu0  ;;  %v5103_v57 = vpop.f32.mrf.mxu1  ;;  %3863 = vmatprep.subr.mxu1 %v3261_v5 }
 0x132   :  { %3754 = vmatprep.mubr.msk.f32.mxu1 %vm6588_vm3, %v5052_v34  ;;  %vm6589_vm1 = vmmov %vm6588_vm3  ;;  %v6591_v56 = vand.u32 15, %v6590_v22  ;;  %v6592_v33 = vmov 0  ;;  %v1281_v27 = vrot.slane %v4894_v42, 1  ;;  %vm6597_vm3 = vcmp.lt.s32.totalorder %v4420_v19, 7  ;;  %3864 = vmatpush3.msra.mxu1 %v3261_v5 }
 0x133   :  { %3818 = vmatprep.mubr.msk.f32.mxu0 %vm6589_vm1, %v5052_v34  ;;  %3755 = vmatmul.mubr.msk.f32.gmra.mxu1 %vm6589_vm1, %v5061_v25  ;;  %vm6596_vm11 = vmmov %vm6589_vm1  ;;  %v1303_v3 = vsel %vm6597_vm3, %v1278_v8, %v1279_v32  ;;  %v1245_v26 = vsel %vm4955_vm2, 0.0, %v5047_v45  ;;  %v5105_v13 = vmax.f32 %v1699_v35, 0.0  ;;  %v1662_v42 = vadd.f32 %v1560_v6, %v4936_v48  ;;  %v6604_v45 = vld [vmem:[#allocation21_spill] sm:$0xff] }
 0x134   :  { %vm5085_vm14 = vcmp.eq.s32.totalorder %v6591_v56, 0  ;;  %3819 = vmatmul.mubr.msk.f32.gmra.mxu0 %vm6596_vm11, %v5061_v25  ;;  %v1575_v1 = vadd.f32 %v3701_v44, %v1145_v11  ;;  %v6598_v22 = vrot.slane %v6552_v17, 7  ;;  %vm6599_vm1 = vcmp.lt.s32.totalorder %v4420_v19, 1  ;;  %v1569_v11 = vpop.f32.mrf.mxu0  ;;  %3865 = vmatprep.subr.mxu1 %v3260_v28 }
 0x135   :  { %v6593_v33 = vsel %vm5085_vm14, 4294967295, %v6592_v33  ;;  %v6600_v62 = vand.u32 15, %v4550_v46  ;;  %v6601_v8 = vmov 0  ;;  %v1120_v37 = vrot.slane %v6604_v45, 7  ;;  %vm6606_vm3 = vmmov %vm6599_vm1  ;;  %3866 = vmatpush3.msra.mxu1 %v3260_v28  ;;  %v6641_v28 = vld [vmem:[#allocation32_spill] sm:$0xff] }
 0x136   :  { %6594 = vst [vmem:[#allocation30_spill] sm:$0xff] %v6593_v33  ;;  %v5112_v56 = vsel %vm6599_vm1, %v6598_v22, %v1118_v38  ;;  %v5121_v35 = vmax.f32 %v1700_v23, 0.0  ;;  %v1702_v48 = vadd.f32 %v4720_v61, %v1663_v30  ;;  %v6605_v17 = vrot.slane %v6571_v51, 7  ;;  %v3704_v23 = vpop.f32.mrf.mxu0 }
 0x137   :  { %vm5116_vm11 = vcmp.eq.s32.totalorder %v6600_v62, 15  ;;  %v1282_v46 = vrot.slane %v4834_v20, 1  ;;  %v1701_v62 = vadd.f32 %v4720_v61, %v1662_v42  ;;  %v1665_v44 = vadd.f32 %v1575_v1, %v1405_v52 }
 0x138   :  { %v6602_v8 = vsel %vm5116_vm11, 4294967295, %v6601_v8  ;;  %v1141_v6 = vsel %vm6606_vm3, %v1118_v38, %v6605_v17  ;;  %v1570_v22 = vadd.f32 %v1569_v11, %v1243_v24  ;;  %vm6607_vm1 = vcmask 523264   ;;  %v6613_v11 = vld [vmem:[#allocation16_spill] sm:$0xff] }
 0x139   :  { %6603 = vst [vmem:[#allocation13_spill] sm:$0xff] %v6602_v8  ;;  %3757 = vmatprep.mubr.msk.f32.mxu1 %vm6607_vm1, %v5105_v13  ;;  %vm6608_vm2 = vmmov %vm6607_vm1  ;;  %v1407_v38 = vsel %vm5002_vm10, 0.0, %v1303_v3  ;;  %vm6611_vm8 = vcmp.lt.s32.totalorder %v4420_v19, 7  ;;  %v1247_v24 = vsel %vm5008_vm13, 0.0, %v5112_v56  ;;  %v6363_v52 = vrot.slane %v4992_v2, 1  ;;  %v5151_v3 = vpop.f32.mrf.mxu1  ;;  %v6618_v56 = vld [vmem:[#allocation24_spill] sm:$0xff] }
 0x13a   :  { %3821 = vmatprep.mubr.msk.f32.mxu0 %vm6608_vm2, %v5105_v13  ;;  %vm6609_vm3 = vmmov %vm6607_vm1  ;;  %v1301_v20 = vsel %vm6611_vm8, %v1280_v54, %v1281_v27  ;;  %v5153_v42 = vmax.f32 %v1701_v62, 0.0  ;;  %v1664_v1 = vadd.f32 %v1570_v22, %v5020_v58  ;;  %v1585_v45 = vadd.f32 %v3704_v23, %v1143_v16 }
 0x13b   :  { %3758 = vmatmul.mubr.msk.f32.gmra.mxu1 %vm6609_vm3, %v5121_v35  ;;  %vm6610_vm0 = vmmov %vm6607_vm1  ;;  %v6614_v17 = vand.u32 15, %v6613_v11  ;;  %v6615_v47 = vmov 0  ;;  %v6364_v36 = vrot.slane %v6618_v56, 7  ;;  %v5163_v50 = vmax.f32 %v1702_v48, 0.0  ;;  %v6625_v48 = vld [vmem:[#allocation25_spill] sm:$0xff] }
 0x13c   :  { %3822 = vmatmul.mubr.msk.f32.gmra.mxu0 %vm6610_vm0, %v5121_v35  ;;  %vm6612_vm2 = vmmov %vm6611_vm8  ;;  %v6619_v62 = vrot.slane %v6571_v51, 7  ;;  %vm6620_vm8 = vcmp.lt.s32.totalorder %v4420_v19, 1  ;;  %v1284_v16 = vrot.slane %v4944_v39, 1  ;;  %v1703_v22 = vadd.f32 %v4720_v61, %v1664_v1  ;;  %3760 = vmatprep.mubr.msk.f32.mxu1 %vm6607_vm1, %v5153_v42 }
 0x13d   :  { %v1302_v30 = vsel %vm6612_vm2, %v1279_v32, %v1280_v54  ;;  %vm5158_vm0 = vcmp.eq.s32.totalorder %v6614_v17, 0  ;;  %v1704_v54 = vadd.f32 %v4720_v61, %v1665_v44  ;;  %v1579_v32 = vpop.f32.mrf.mxu0  ;;  %v1667_v23 = vadd.f32 %v1585_v45, %v1407_v38  ;;  %vm6621_vm3 = vmmov %vm6607_vm1  ;;  %v5195_v45 = vpop.f32.mrf.mxu1 }
 0x13e   :  { %v6616_v47 = vsel %vm5158_vm0, 4294967295, %v6615_v47  ;;  %v1140_v58 = vsel %vm6620_vm8, %v6619_v62, %v1120_v37  ;;  %v1580_v11 = vadd.f32 %v1579_v32, %v1245_v26  ;;  %3824 = vmatprep.mubr.msk.f32.mxu0 %vm6621_vm3, %v5153_v42  ;;  %v6622_v5 = vand.u32 15, %v4570_v59  ;;  %vm6626_vm8 = vmmov %vm6607_vm1 }
 0x13f   :  { %6617 = vst [vmem:[#allocation8_spill] sm:$0xff] %v6616_v47  ;;  %v6623_v51 = vmov 0  ;;  %v1122_v44 = vrot.slane %v6625_v48, 7  ;;  %v1409_v39 = vsel %vm5057_vm7, 0.0, %v1301_v20  ;;  %v3707_v1 = vpop.f32.mrf.mxu0  ;;  %3761 = vmatmul.mubr.msk.f32.gmra.mxu1 %vm6626_vm8, %v5163_v50  ;;  %v6627_v26 = vrot.slane %v6595_v31, 7 }
 0x140   :  { %vm5178_vm2 = vcmp.eq.s32.totalorder %v6622_v5, 15  ;;  %3825 = vmatmul.mubr.msk.f32.gmra.mxu0 %vm6607_vm1, %v5163_v50  ;;  %vm6628_vm3 = vcmp.lt.s32.totalorder %v4420_v19, 1  ;;  %vm6629_vm13 = vcmp.lt.s32.totalorder %v4420_v19, 7  ;;  %v5197_v17 = vmax.f32 %v1703_v22, 0.0 }
 0x141   :  { %v6624_v51 = vsel %vm5178_vm2, 4294967295, %v6623_v51  ;;  %v1139_v59 = vsel %vm6628_vm3, %v1120_v37, %v6627_v26  ;;  %v1300_v38 = vsel %vm6629_vm13, %v1281_v27, %v1282_v46  ;;  %v1666_v20 = vadd.f32 %v1580_v11, %v5070_v10  ;;  %vm6630_vm8 = vmmov %vm6629_vm13  ;;  %v6635_v37 = vld [vmem:[#allocation18_spill] sm:$0xff]  ;;  %v6647_v11 = vld [vmem:[#allocation19_spill] sm:$0xff] }
 0x142   :  { %v1595_v32 = vadd.f32 %v3707_v1, %v1141_v6  ;;  %v1299_v62 = vsel %vm6630_vm8, %v1282_v46, %v6363_v52  ;;  %v6631_v5 = vand.u32 15, %v4573_v49  ;;  %v6632_v48 = vmov 0  ;;  %v1589_v46 = vpop.f32.mrf.mxu0 }
 0x143   :  { %v6636_v27 = vand.u32 15, %v6635_v37  ;;  %v6637_v26 = vmov 0  ;;  %v5217_v6 = vmax.f32 %v1704_v54, 0.0  ;;  %v1706_v22 = vadd.f32 %v4720_v61, %v1667_v23 }
 0x144   :  { %vm5206_vm1 = vcmp.eq.s32.totalorder %v6631_v5, 15  ;;  %v1249_v49 = vsel %vm5085_vm14, 0.0, %v1140_v58  ;;  %v1705_v1 = vadd.f32 %v4720_v61, %v1666_v20  ;;  %v1669_v5 = vadd.f32 %v1595_v32, %v1409_v39  ;;  %v5244_v32 = vpop.f32.mrf.mxu1 }
 0x145   :  { %v6633_v48 = vsel %vm5206_vm1, 4294967295, %v6632_v48  ;;  %vm5212_vm13 = vcmp.eq.s32.totalorder %v6636_v27, 0  ;;  %v1590_v37 = vadd.f32 %v1589_v46, %v1247_v24  ;;  %vm6639_vm3 = vcmask 523264   ;;  %v3710_v27 = vpop.f32.mrf.mxu0 }
 0x146   :  { %6634 = vst [vmem:[#allocation9_spill] sm:$0xff] %v6633_v48  ;;  %v6638_v26 = vsel %vm5212_vm13, 4294967295, %v6637_v26  ;;  %3763 = vmatprep.mubr.msk.f32.mxu1 %vm6639_vm3, %v5197_v17  ;;  %vm6640_vm8 = vmmov %vm6639_vm3  ;;  %v1124_v54 = vrot.slane %v6641_v28, 7  ;;  %v1411_v23 = vsel %vm5116_vm11, 0.0, %v1299_v62  ;;  %vm6644_vm10 = vcmp.lt.s32.totalorder %v4420_v19, 1 }
 0x147   :  { %3827 = vmatprep.mubr.msk.f32.mxu0 %vm6640_vm8, %v5197_v17  ;;  %vm6642_vm14 = vmmov %vm6639_vm3  ;;  %v1137_v24 = vsel %vm6644_vm10, %v1122_v44, %v6364_v36  ;;  %v6645_v58 = vrot.slane %v6595_v31, 7  ;;  %v5246_v62 = vmax.f32 %v1705_v1, 0.0  ;;  %v1668_v46 = vadd.f32 %v1590_v37, %v1302_v30  ;;  %v1599_v8 = vpop.f32.mrf.mxu0 }
 0x148   :  { %3764 = vmatmul.mubr.msk.f32.gmra.mxu1 %vm6642_vm14, %v5217_v6  ;;  %vm6643_vm7 = vmmov %vm6639_vm3  ;;  %v1605_v28 = vadd.f32 %v3710_v27, %v1139_v59  ;;  %v6648_v52 = vand.u32 15, %v6647_v11  ;;  %v6649_v10 = vmov 0  ;;  %v5254_v36 = vmax.f32 %v1706_v22, 0.0  ;;  %v6656_v59 = vld [vmem:[#allocation29_spill] sm:$0xff] }
 0x149   :  { %3828 = vmatmul.mubr.msk.f32.gmra.mxu0 %vm6643_vm7, %v5217_v6  ;;  %vm6646_vm3 = vmmov %vm6644_vm10  ;;  %v1708_v31 = vadd.f32 %v4720_v61, %v1669_v5  ;;  %vm6653_vm10 = vcmp.lt.s32.totalorder %v4420_v19, 7  ;;  %v6654_v1 = vrot.slane %v4992_v2, 1  ;;  %v1707_v11 = vadd.f32 %v4720_v61, %v1668_v46  ;;  %3766 = vmatprep.mubr.msk.f32.mxu1 %vm6640_vm8, %v5246_v62  ;;  %v5271_v5 = vpop.f32.mrf.mxu1  ;;  %v6658_v2 = vld [vmem:[#allocation38_spill] sm:$0xff]  ;;  %v3713_v20 = vpop.f32.mrf.mxu0 }
 0x14a   :  { %v1138_v39 = vsel %vm6646_vm3, %v6645_v58, %v1122_v44  ;;  %vm5250_vm7 = vcmp.eq.s32.totalorder %v6648_v52, 0  ;;  %v6652_v44 = vrot.slane %v5103_v57, 1  ;;  %vm6655_vm14 = vmmov %vm6653_vm10  ;;  %v1125_v52 = vrot.slane %v6656_v59, 7 }
 0x14b   :  { %v6650_v10 = vsel %vm5250_vm7, 4294967295, %v6649_v10  ;;  %v1298_v30 = vsel %vm6655_vm14, %v6654_v1, %v1284_v16  ;;  %v1671_v37 = vadd.f32 %v1605_v28, %v1411_v23  ;;  %v1600_v22 = vadd.f32 %v1599_v8, %v1249_v49  ;;  %vm6657_vm3 = vmmov %vm6640_vm8  ;;  %v1609_v47 = vpop.f32.mrf.mxu0 }
 0x14c   :  { %6651 = vst [vmem:[#allocation14_spill] sm:$0xff] %v6650_v10  ;;  %v1297_v58 = vsel %vm6653_vm10, %v1284_v16, %v6652_v44  ;;  %3830 = vmatprep.mubr.msk.f32.mxu0 %vm6657_vm3, %v5246_v62  ;;  %v1126_v44 = vrot.slane %v6658_v2, 7  ;;  %vm6659_vm10 = vmmov %vm6657_vm3  ;;  %v1251_v8 = vsel %vm5158_vm0, 0.0, %v1138_v39  ;;  %v6661_v16 = vrot.slane %v6618_v56, 7 }
 0x14d   :  { %3767 = vmatmul.mubr.msk.f32.gmra.mxu1 %vm6659_vm10, %v5254_v36  ;;  %vm6660_vm14 = vmmov %vm6657_vm3  ;;  %vm6662_vm8 = vcmp.lt.s32.totalorder %v4420_v19, 1  ;;  %v5285_v23 = vmax.f32 %v1707_v11, 0.0  ;;  %v1670_v46 = vadd.f32 %v1600_v22, %v1300_v38  ;;  %v1615_v28 = vadd.f32 %v3713_v20, %v1137_v24 }
 0x14e   :  { %3831 = vmatmul.mubr.msk.f32.gmra.mxu0 %vm6660_vm14, %v5254_v36  ;;  %v1136_v49 = vsel %vm6662_vm8, %v6661_v16, %v1124_v54  ;;  %v6663_v1 = vrot.slane %v5195_v45, 1  ;;  %v6664_v59 = vrot.slane %v5050_v18, 1  ;;  %vm6665_vm3 = vcmp.lt.s32.totalorder %v4420_v19, 7  ;;  %v6666_v16 = vld [vmem:[#allocation36_spill] sm:$0xff]  ;;  %vm6667_vm14 = vmmov %vm6659_vm10 }
 0x14f   :  { %v5293_v27 = vmax.f32 %v1708_v31, 0.0  ;;  %v1710_v39 = vadd.f32 %v4720_v61, %v1671_v37  ;;  %v1413_v56 = vsel %vm5178_vm2, 0.0, %v1297_v58  ;;  %v6375_v11 = vrot.slane %v5271_v5, 1  ;;  %3769 = vmatprep.mubr.msk.f32.mxu1 %vm6659_vm10, %v5285_v23  ;;  %3833 = vmatprep.mubr.msk.f32.mxu0 %vm6667_vm14, %v5285_v23 }
 0x150   :  { %v1295_v2 = vsel %vm6665_vm3, %v6664_v59, %v6663_v1  ;;  %v1127_v38 = vrot.slane %v6666_v16, 7  ;;  %v1709_v24 = vadd.f32 %v4720_v61, %v1670_v46  ;;  %v1673_v20 = vadd.f32 %v1615_v28, %v1413_v56  ;;  %v3716_v1 = vpop.f32.mrf.mxu0  ;;  %vm6668_vm3 = vmmov %vm6659_vm10  ;;  %v6671_v59 = vld [vmem:[#allocation41_spill] sm:$0xff] }
 0x151   :  { %v1610_v22 = vadd.f32 %v1609_v47, %v1251_v8  ;;  %v1135_v58 = vsel %vm6662_vm8, %v1124_v54, %v1125_v52  ;;  %v1415_v37 = vsel %vm5206_vm1, 0.0, %v1295_v2  ;;  %3770 = vmatmul.mubr.msk.f32.gmra.mxu1 %vm6668_vm3, %v5293_v27  ;;  %vm6669_vm0 = vmmov %vm6668_vm3  ;;  %v1253_v47 = vsel %vm5212_vm13, 0.0, %v1136_v49 }
 0x152   :  { %3834 = vmatmul.mubr.msk.f32.gmra.mxu0 %vm6669_vm0, %v5293_v27  ;;  %v5316_v8 = vmax.f32 %v1709_v24, 0.0  ;;  %v1625_v28 = vadd.f32 %v3716_v1, %v1135_v58  ;;  %vm6670_vm10 = vmmov %vm6662_vm8  ;;  %v1128_v56 = vrot.slane %v6671_v59, 7  ;;  %v5321_v2 = vmax.f32 %v1710_v39, 0.0  ;;  %v1619_v31 = vpop.f32.mrf.mxu0 }
 0x153   :  { %v1672_v46 = vadd.f32 %v1610_v22, %v1298_v30  ;;  %v1134_v54 = vsel %vm6670_vm10, %v1125_v52, %v1126_v44  ;;  %v1712_v16 = vadd.f32 %v4720_v61, %v1673_v20  ;;  %v6672_v48 = vrot.slane %v5151_v3, 1  ;;  %vm6674_vm14 = vmmov %vm6668_vm3  ;;  %v6676_v52 = vld [vmem:[#allocation33_spill] sm:$0xff] }
 0x154   :  { %vm6673_vm0 = vcmp.lt.s32.totalorder %v4420_v19, 7  ;;  %v1675_v24 = vadd.f32 %v1625_v28, %v1415_v37  ;;  %v1620_v22 = vadd.f32 %v1619_v31, %v1253_v47  ;;  %3772 = vmatprep.mubr.msk.f32.mxu1 %vm6674_vm14, %v5316_v8  ;;  %vm6675_vm8 = vmmov %vm6668_vm3  ;;  %v6677_v39 = vand.u32 15, %v6676_v52  ;;  %v3719_v1 = vpop.f32.mrf.mxu0  ;;  %v6691_v52 = vld [vmem:[#allocation3_spill] sm:$0xff] }
 0x155   :  { %v1293_v49 = vsel %vm6673_vm0, %v6672_v48, %v6375_v11  ;;  %v1711_v30 = vadd.f32 %v4720_v61, %v1672_v46  ;;  %3836 = vmatprep.mubr.msk.f32.mxu0 %vm6675_vm8, %v5316_v8  ;;  %v6678_v20 = vmov 0  ;;  %v6681_v58 = vrot.slane %v5050_v18, 1  ;;  %vm6683_vm10 = vmmov %vm6673_vm0  ;;  %v6686_v46 = vld [vmem:[#allocation22_spill] sm:$0xff] }
 0x156   :  { %vm5337_vm3 = vcmp.eq.s32.totalorder %v6677_v39, 15  ;;  %v6682_v48 = vrot.slane %v5103_v57, 1  ;;  %vm6684_vm0 = vcmp.lt.s32.totalorder %v4420_v19, 1  ;;  %vm6685_vm14 = vmmov %vm6675_vm8  ;;  %3837 = vmatmul.mubr.msk.f32.gmra.mxu0 %vm6675_vm8, %v5321_v2  ;;  %v1255_v47 = vsel %vm5250_vm7, 0.0, %v1134_v54 }
 0x157   :  { %v6679_v20 = vsel %vm5337_vm3, 4294967295, %v6678_v20  ;;  %v1133_v31 = vsel %vm6684_vm0, %v1126_v44, %v1127_v38  ;;  %3773 = vmatmul.mubr.msk.f32.gmra.mxu1 %vm6685_vm14, %v5321_v2  ;;  %v6687_v18 = vand.u32 15, %v6686_v46  ;;  %v6688_v57 = vmov 0  ;;  %vm6694_vm14 = vmmov %vm6675_vm8 }
 0x158   :  { %6680 = vst [vmem:[#allocation10_spill] sm:$0xff] %v6679_v20  ;;  %v1296_v37 = vsel %vm6683_vm10, %v6682_v48, %v6681_v58  ;;  %v5361_v28 = vmax.f32 %v1711_v30, 0.0  ;;  %v1635_v44 = vadd.f32 %v3719_v1, %v1133_v31  ;;  %v6692_v39 = vrot.slane %v6691_v52, 1 }
 0x159   :  { %vm5357_vm1 = vcmp.eq.s32.totalorder %v6687_v18, 15  ;;  %v1674_v59 = vadd.f32 %v1620_v22, %v1296_v37  ;;  %v6693_v58 = vrot.slane %v5244_v32, 1  ;;  %v5369_v11 = vmax.f32 %v1712_v16, 0.0  ;;  %v1629_v18 = vpop.f32.mrf.mxu0  ;;  %v6695_v16 = vld [vmem:[#allocation23_spill] sm:$0xff] }
 0x15a   :  { %v6689_v57 = vsel %vm5357_vm1, 4294967295, %v6688_v57  ;;  %v1714_v54 = vadd.f32 %v4720_v61, %v1675_v24  ;;  %v1417_v46 = vsel %vm5337_vm3, 0.0, %v1293_v49  ;;  %v1132_v30 = vsel %vm6684_vm0, %v1127_v38, %v1128_v56  ;;  %3775 = vmatprep.mubr.msk.f32.mxu1 %vm6694_vm14, %v5361_v28  ;;  %3839 = vmatprep.mubr.msk.f32.mxu0 %vm6675_vm8, %v5361_v28  ;;  %vm6705_vm3 = vmmov %vm6675_vm8 }
 0x15b   :  { %6690 = vst [vmem:[#allocation12_spill] sm:$0xff] %v6689_v57  ;;  %v1323_v48 = vsel %vm6683_vm10, %v6693_v58, %v6692_v39  ;;  %v1713_v22 = vadd.f32 %v4720_v61, %v1674_v59  ;;  %v1677_v37 = vadd.f32 %v1635_v44, %v1417_v46  ;;  %v1630_v31 = vadd.f32 %v1629_v18, %v1255_v47  ;;  %v3722_v52 = vpop.f32.mrf.mxu0 }
 0x15c   :  { %v6696_v1 = vand.u32 15, %v6695_v16  ;;  %v6697_v24 = vmov 0  ;;  %v6700_v49 = vrot.slane %v5151_v3, 1  ;;  %v6701_v38 = vrot.slane %v5195_v45, 1  ;;  %3776 = vmatmul.mubr.msk.f32.gmra.mxu1 %vm6675_vm8, %v5369_v11  ;;  %3840 = vmatmul.mubr.msk.f32.gmra.mxu0 %vm6705_vm3, %v5369_v11 }
 0x15d   :  { %vm6702_vm0 = vcmp.lt.s32.totalorder %v4420_v19, 7  ;;  %v6703_v47 = vrot.slane %v4634_v4, 7  ;;  %vm6704_vm14 = vcmp.lt.s32.totalorder %v4420_v19, 1  ;;  %v1745_v39 = vmax.f32 %v1713_v22, 0.0 }
 0x15e   :  { %vm5383_vm10 = vcmp.eq.s32.totalorder %v6696_v1, 0  ;;  %v1294_v59 = vsel %vm6702_vm0, %v6701_v38, %v6700_v49  ;;  %v1746_v46 = vmax.f32 %v1714_v54, 0.0  ;;  %v1716_v45 = vadd.f32 %v4720_v61, %v1677_v37  ;;  %vm6706_vm0 = vmmov %vm6705_vm3 }
 0x15f   :  { %v6698_v24 = vsel %vm5383_vm10, 4294967295, %v6697_v24  ;;  %v1131_v44 = vsel %vm6704_vm14, %v1128_v56, %v6703_v47  ;;  %v1676_v58 = vadd.f32 %v1630_v31, %v1294_v59  ;;  %v1419_v18 = vsel %vm5357_vm1, 0.0, %v1323_v48  ;;  %v1639_v56 = vpop.f32.mrf.mxu0  ;;  %3778 = vmatprep.mubr.msk.f32.mxu1 %vm6706_vm0, %v1745_v39  ;;  %vm6707_vm3 = vmmov %vm6706_vm0  ;;  %v2991_v47 = vld [vmem:[%s6273_s5 + $0x18] sm:$0xff] }
 0x160   :  { %6699 = vst [vmem:[#allocation15_spill] sm:$0xff] %v6698_v24  ;;  %v1645_v3 = vadd.f32 %v3722_v52, %v1131_v44  ;;  %v1257_v4 = vsel %vm5383_vm10, 0.0, %v1132_v30  ;;  %3842 = vmatprep.mubr.msk.f32.mxu0 %vm6707_vm3, %v1745_v39  ;;  %v6708_v22 = vrot.slane %v5244_v32, 1  ;;  %v6709_v54 = vrot.slane %v5271_v5, 1  ;;  %vm6711_vm8 = vmmov %vm6706_vm0 }
 0x161   :  { %v1715_v16 = vadd.f32 %v4720_v61, %v1676_v58  ;;  %v1640_v49 = vadd.f32 %v1639_v56, %v1257_v4  ;;  %vm6710_vm14 = vcmp.lt.s32.totalorder %v4420_v19, 7  ;;  %3779 = vmatmul.mubr.msk.f32.gmra.mxu1 %vm6711_vm8, %v1746_v46  ;;  %vm6712_vm1 = vmmov %vm6706_vm0  ;;  %v1748_v31 = vmax.f32 %v1716_v45, 0.0 }
 0x162   :  { %v1679_v1 = vadd.f32 %v1645_v3, %v1419_v18  ;;  %v1292_v37 = vsel %vm6710_vm14, %v6709_v54, %v6708_v22  ;;  %3843 = vmatmul.mubr.msk.f32.gmra.mxu0 %vm6712_vm1, %v1746_v46  ;;  %vm6713_vm3 = vmmov %vm6706_vm0 }
 0x163   :  { %v1747_v48 = vmax.f32 %v1715_v16, 0.0  ;;  %v1678_v30 = vadd.f32 %v1640_v49, %v1292_v37  ;;  %vm6714_vm10 = vmmov %vm6706_vm0 }
 0x164   :  { %v1718_v38 = vadd.f32 %v4720_v61, %v1679_v1  ;;  %vm6715_vm7 = vmmov %vm6706_vm0 }
 0x165   :  { %v1717_v59 = vadd.f32 %v4720_v61, %v1678_v30  ;;  %3781 = vmatprep.mubr.msk.f32.mxu1 %vm6706_vm0, %v1747_v48  ;;  %3845 = vmatprep.mubr.msk.f32.mxu0 %vm6713_vm3, %v1747_v48  ;;  %vm6716_vm14 = vmmov %vm6706_vm0  ;;  %v2995_v61 = vld [vmem:[%s6273_s5 + $0x38] sm:$0xff] }
 0x166   :  { %3782 = vmatmul.mubr.msk.f32.gmra.mxu1 %vm6714_vm10, %v1748_v31  ;;  %3846 = vmatmul.mubr.msk.f32.gmra.mxu0 %vm6715_vm7, %v1748_v31  ;;  %v1750_v5 = vmax.f32 %v1718_v38, 0.0  ;;  %vm6717_vm1 = vmmov %vm6706_vm0 }
 0x167   :  { %v1749_v32 = vmax.f32 %v1717_v59, 0.0  ;;  %vm6718_vm8 = vmmov %vm6706_vm0  ;;  %3915 = vmatprep.subr.mxu0 %v2995_v61 }
 0x168   :  { %vm6719_vm13 = vmmov %vm6706_vm0  ;;  %3916 = vmatpush3.msra.mxu0 %v2995_v61 }
 0x169   :  { %3784 = vmatprep.mubr.msk.f32.mxu1 %vm6716_vm14, %v1749_v32  ;;  %3848 = vmatprep.mubr.msk.f32.mxu0 %vm6717_vm1, %v1749_v32  ;;  %vm6720_vm2 = vmmov %vm6706_vm0 }
 0x16a   :  { %3785 = vmatmul.mubr.msk.f32.gmra.mxu1 %vm6718_vm8, %v1750_v5  ;;  %3849 = vmatmul.mubr.msk.f32.gmra.mxu0 %vm6719_vm13, %v1750_v5  ;;  %vm6721_vm10 = vmmov %vm6706_vm0 }
 0x16b   :  { %3867 = vmatprep.mubr.msk.f32.mxu1 %vm6720_vm2, %v4777_v55  ;;  %vm6722_vm7 = vmmov %vm6706_vm0  ;;  %v2994_v55 = vld [vmem:[%s6273_s5 + $0x30] sm:$0xff] }
 0x16c   :  { %vm6723_vm3 = vmmov %vm6706_vm0  ;;  %3917 = vmatprep.subr.mxu0 %v2994_v55 }
 0x16d   :  { %vm6724_vm14 = vmmov %vm6706_vm0  ;;  %3918 = vmatpush3.msra.mxu0 %v2994_v55 }
 0x16e   :  { %3868 = vmatmul.mubr.msk.f32.vlgmr.msra.gmra.mxu1 %vm6706_vm0, %v4789_v29  ;;  %vm6725_vm13 = vmmov %vm6706_vm0 }
 0x16f   :  { %3870 = vmatprep.mubr.msk.f32.mxu1 %vm6721_vm10, %v4836_v41  ;;  %vm6726_vm2 = vmmov %vm6706_vm0 }
 0x170   :  { %vm6727_vm1 = vmmov %vm6706_vm0 }
 0x171   :  { %vm6728_vm8 = vmmov %vm6706_vm0 }
 0x172   :  { %3871 = vmatmul.mubr.msk.f32.gmra.mxu1 %vm6722_vm7, %v4842_v21  ;;  %vm6729_vm10 = vmmov %vm6706_vm0  ;;  %v2993_v21 = vld [vmem:[%s6273_s5 + $0x28] sm:$0xff] }
 0x173   :  { %3873 = vmatprep.mubr.msk.f32.mxu1 %vm6723_vm3, %v4896_v60  ;;  %vm6730_vm7 = vmmov %vm6706_vm0  ;;  %3919 = vmatprep.subr.mxu0 %v2993_v21 }
 0x174   :  { %vm6731_vm3 = vmmov %vm6706_vm0  ;;  %3920 = vmatpush3.msra.mxu0 %v2993_v21 }
 0x176   :  { %3874 = vmatmul.mubr.msk.f32.gmra.mxu1 %vm6724_vm14, %v4908_v0  ;;  %vm6732_vm14 = vmmov %vm6706_vm0 }
 0x177   :  { %3876 = vmatprep.mubr.msk.f32.mxu1 %vm6725_vm13, %v4946_v9  ;;  %vm6733_vm13 = vmmov %vm6706_vm0 }
 0x17a   :  { %3877 = vmatmul.mubr.msk.f32.gmra.mxu1 %vm6726_vm2, %v4959_v14  ;;  %vm6734_vm2 = vmmov %vm6706_vm0 }
 0x17b   :  { %3879 = vmatprep.mubr.msk.f32.mxu1 %vm6727_vm1, %v4994_v43  ;;  %vm6735_vm1 = vmmov %vm6706_vm0 }
 0x17e   :  { %3880 = vmatmul.mubr.msk.f32.gmra.mxu1 %vm6728_vm8, %v5012_v63  ;;  %vm6736_vm8 = vmmov %vm6706_vm0 }
 0x17f   :  { %3882 = vmatprep.mubr.msk.f32.mxu1 %vm6706_vm0, %v5052_v34 }
 0x182   :  { %3883 = vmatmul.mubr.msk.f32.gmra.mxu1 %vm6729_vm10, %v5061_v25  ;;  %vm6737_vm10 = vmmov %vm6706_vm0 }
 0x183   :  { %3885 = vmatprep.mubr.msk.f32.mxu1 %vm6730_vm7, %v5105_v13  ;;  %vm6738_vm7 = vmmov %vm6706_vm0 }
 0x186   :  { %3886 = vmatmul.mubr.msk.f32.gmra.mxu1 %vm6731_vm3, %v5121_v35  ;;  %vm6739_vm3 = vmmov %vm6706_vm0 }
 0x187   :  { %3888 = vmatprep.mubr.msk.f32.mxu1 %vm6732_vm14, %v5153_v42  ;;  %vm6740_vm14 = vmmov %vm6706_vm0 }
 0x18a   :  { %3889 = vmatmul.mubr.msk.f32.gmra.mxu1 %vm6733_vm13, %v5163_v50  ;;  %vm6741_vm13 = vmmov %vm6706_vm0 }
 0x18b   :  { %3891 = vmatprep.mubr.msk.f32.mxu1 %vm6734_vm2, %v5197_v17  ;;  %vm6742_vm2 = vmmov %vm6706_vm0 }
 0x18e   :  { %3892 = vmatmul.mubr.msk.f32.gmra.mxu1 %vm6735_vm1, %v5217_v6  ;;  %vm6743_vm1 = vmmov %vm6706_vm0 }
 0x18f   :  { %3894 = vmatprep.mubr.msk.f32.mxu1 %vm6736_vm8, %v5246_v62  ;;  %vm6744_vm8 = vmmov %vm6706_vm0 }
 0x192   :  { %3895 = vmatmul.mubr.msk.f32.gmra.mxu1 %vm6706_vm0, %v5254_v36  ;;  %v2992_v36 = vld [vmem:[%s6273_s5 + $0x20] sm:$0xff] }
 0x193   :  { %3897 = vmatprep.mubr.msk.f32.mxu1 %vm6737_vm10, %v5285_v23  ;;  %vm6745_vm10 = vmmov %vm6706_vm0  ;;  %3921 = vmatprep.subr.mxu0 %v2992_v36 }
 0x194   :  { %3922 = vmatpush3.msra.mxu0 %v2992_v36  ;;  %v2989_v36 = vld [vmem:[%s6273_s5 + $0x8] sm:$0xff] }
 0x195   :  { %3923 = vmatprep.subr.mxu0 %v2991_v47 }
 0x196   :  { %3898 = vmatmul.mubr.msk.f32.gmra.mxu1 %vm6738_vm7, %v5293_v27  ;;  %vm6746_vm7 = vmmov %vm6706_vm0  ;;  %3924 = vmatpush3.msra.mxu0 %v2991_v47 }
 0x197   :  { %3900 = vmatprep.mubr.msk.f32.mxu1 %vm6739_vm3, %v5316_v8  ;;  %vm6747_vm3 = vmmov %vm6706_vm0 }
 0x19a   :  { %3901 = vmatmul.mubr.msk.f32.gmra.mxu1 %vm6740_vm14, %v5321_v2  ;;  %vm6749_vm14 = vcmp.lt.s32.totalorder %v4420_v19, 1 }
 0x19b   :  { %3903 = vmatprep.mubr.msk.f32.mxu1 %vm6741_vm13, %v5361_v28  ;;  %vm6750_vm13 = vmmov %vm6749_vm14 }
 0x19e   :  { %3904 = vmatmul.mubr.msk.f32.gmra.mxu1 %vm6742_vm2, %v5369_v11  ;;  %vm6751_vm2 = vmmov %vm6750_vm13 }
 0x19f   :  { %3906 = vmatprep.mubr.msk.f32.mxu1 %vm6743_vm1, %v1745_v39  ;;  %vm6752_vm1 = vmmov %vm6751_vm2 }
 0x1a2   :  { %3907 = vmatmul.mubr.msk.f32.gmra.mxu1 %vm6744_vm8, %v1746_v46  ;;  %vm6754_vm8 = vmmov %vm6752_vm1 }
 0x1a3   :  { %3909 = vmatprep.mubr.msk.f32.mxu1 %vm6706_vm0, %v1747_v48  ;;  %vm6755_vm0 = vmmov %vm6752_vm1 }
 0x1a6   :  { %3910 = vmatmul.mubr.msk.f32.gmra.mxu1 %vm6745_vm10, %v1748_v31  ;;  %vm6757_vm10 = vmmov %vm6755_vm0 }
 0x1a7   :  { %3912 = vmatprep.mubr.msk.f32.mxu1 %vm6746_vm7, %v1749_v32  ;;  %vm6759_vm7 = vmmov %vm6755_vm0 }
 0x1aa   :  { %3913 = vmatmul.mubr.msk.f32.gmra.mxu1 %vm6747_vm3, %v1750_v5  ;;  %vm6761_vm3 = vmmov %vm6755_vm0 }
 0x1d4   :  { %v3741_v29 = vpop.f32.mrf.mxu1 }
 0x1d5   :  { %v5491_v41 = vpop.f32.mrf.mxu0  ;;  %v2325_v50 = vrot.slane %v3741_v29, 7 }
 0x1d6   :  { %v5496_v60 = vpop.f32.mrf.mxu1 }
 0x1d7   :  { %v5498_v0 = vpop.f32.mrf.mxu0  ;;  %v6388_v9 = vrot.slane %v5496_v60, 7 }
 0x1d8   :  { %6748 = vst [vmem:[#allocation17_spill] sm:$0xff] %v5498_v0 }
 0x1d9   :  { %v5510_v63 = vsel %vm6749_vm14, %v6388_v9, %v2325_v50  ;;  %vm6763_vm14 = vmmov %vm6755_vm0 }
 0x1da   :  { %v3744_v43 = vpop.f32.mrf.mxu1 }
 0x1db   :  { %v5501_v14 = vpop.f32.mrf.mxu0  ;;  %v2327_v13 = vrot.slane %v3744_v43, 7  ;;  %v2990_v43 = vld [vmem:[%s6273_s5 + $0x10] sm:$0xff] }
 0x1dc   :  { %v1932_v34 = vpop.f32.mrf.mxu1  ;;  %3925 = vmatprep.subr.mxu0 %v2990_v43 }
 0x1dd   :  { %v5512_v25 = vpop.f32.mrf.mxu0  ;;  %v2326_v35 = vrot.slane %v1932_v34, 7  ;;  %3926 = vmatpush3.msra.mxu0 %v2990_v43 }
 0x1de   :  { %v3747_v42 = vpop.f32.mrf.mxu1  ;;  %3927 = vmatprep.subr.mxu0 %v2989_v36 }
 0x1df   :  { %v5514_v17 = vpop.f32.mrf.mxu0  ;;  %v5518_v6 = vsel %vm6750_vm13, %v2326_v35, %v2327_v13  ;;  %v5524_v23 = vsel %vm6751_vm2, %v2325_v50, %v2326_v35  ;;  %v2329_v11 = vrot.slane %v3747_v42, 7  ;;  %vm6765_vm13 = vmmov %vm6755_vm0  ;;  %3928 = vmatpush3.msra.mxu0 %v2989_v36 }
 0x1e0   :  { %v1942_v62 = vpop.f32.mrf.mxu1  ;;  %vm6767_vm2 = vmmov %vm6755_vm0 }
 0x1e1   :  { %v5520_v27 = vpop.f32.mrf.mxu0  ;;  %v2328_v8 = vrot.slane %v1942_v62, 7  ;;  %v2988_v62 = vld [vmem:[%s6273_s5] sm:$0xff] }
 0x1e2   :  { %3929 = vmatprep.subr.mxu0 %v2988_v62 }
 0x1e3   :  { %v5533_v44 = vsel %vm6752_vm1, %v2328_v8, %v2329_v11  ;;  %v5539_v58 = vsel %vm6754_vm8, %v2327_v13, %v2328_v8  ;;  %vm6769_vm1 = vmmov %vm6755_vm0  ;;  %3930 = vmatpush3.msra.mxu0 %v2988_v62 }
 0x1e4   :  { %6753 = vst [vmem:[#allocation21_spill] sm:$0xff] %v5533_v44  ;;  %vm6770_vm8 = vmmov %vm6755_vm0 }
 0x1e7   :  { %v3750_v2 = vpop.f32.mrf.mxu1 }
 0x1e8   :  { %v5526_v28 = vpop.f32.mrf.mxu0  ;;  %v2331_v3 = vrot.slane %v3750_v2, 7 }
 0x1e9   :  { %v1952_v52 = vpop.f32.mrf.mxu1 }
 0x1ea   :  { %v5535_v39 = vpop.f32.mrf.mxu0  ;;  %v2330_v46 = vrot.slane %v1952_v52, 7 }
 0x1ec   :  { %v5545_v4 = vsel %vm6755_vm0, %v2330_v46, %v2331_v3  ;;  %v5551_v1 = vsel %vm6757_vm10, %v2329_v11, %v2330_v46  ;;  %vm6773_vm10 = vmmov %vm6755_vm0 }
 0x1ed   :  { %6756 = vst [vmem:[#allocation16_spill] sm:$0xff] %v5545_v4  ;;  %6758 = vst [vmem:[#allocation24_spill] sm:$0xff] %v5551_v1 }
 0x1ee   :  { %v3753_v45 = vpop.f32.mrf.mxu1 }
 0x1ef   :  { %v5541_v18 = vpop.f32.mrf.mxu0  ;;  %v2333_v49 = vrot.slane %v3753_v45, 7 }
 0x1f0   :  { %v1962_v56 = vpop.f32.mrf.mxu1 }
 0x1f1   :  { %v5547_v16 = vpop.f32.mrf.mxu0  ;;  %v2332_v22 = vrot.slane %v1962_v56, 7 }
 0x1f3   :  { %v3756_v54 = vpop.f32.mrf.mxu1  ;;  %v5557_v48 = vsel %vm6759_vm7, %v2332_v22, %v2333_v49  ;;  %v5563_v38 = vsel %vm6761_vm3, %v2331_v3, %v2332_v22  ;;  %vm6775_vm7 = vmmov %vm6755_vm0 }
 0x1f4   :  { %v5553_v37 = vpop.f32.mrf.mxu0  ;;  %6760 = vst [vmem:[#allocation25_spill] sm:$0xff] %v5557_v48  ;;  %6762 = vst [vmem:[#allocation18_spill] sm:$0xff] %v5563_v38  ;;  %v2335_v59 = vrot.slane %v3756_v54, 7 }
 0x1f5   :  { %v1972_v30 = vpop.f32.mrf.mxu1  ;;  %vm6777_vm3 = vmmov %vm6755_vm0 }
 0x1f6   :  { %v5559_v31 = vpop.f32.mrf.mxu0  ;;  %v2334_v32 = vrot.slane %v1972_v30, 7 }
 0x1f8   :  { %v5569_v55 = vsel %vm6763_vm14, %v2334_v32, %v2335_v59  ;;  %v5575_v50 = vsel %vm6765_vm13, %v2333_v49, %v2334_v32  ;;  %vm6779_vm14 = vmmov %vm6755_vm0  ;;  %vm6780_vm13 = vcmp.lt.s32.totalorder %v4420_v19, 7 }
 0x1f9   :  { %6764 = vst [vmem:[#allocation32_spill] sm:$0xff] %v5569_v55  ;;  %6766 = vst [vmem:[#allocation19_spill] sm:$0xff] %v5575_v50 }
 0x1fb   :  { %v3759_v5 = vpop.f32.mrf.mxu1 }
 0x1fc   :  { %v5565_v61 = vpop.f32.mrf.mxu0  ;;  %v2337_v34 = vrot.slane %v3759_v5, 7 }
 0x1fd   :  { %v1982_v29 = vpop.f32.mrf.mxu1 }
 0x1fe   :  { %v5571_v21 = vpop.f32.mrf.mxu0  ;;  %v2336_v13 = vrot.slane %v1982_v29, 7 }
 0x1ff   :  { %v3762_v35 = vpop.f32.mrf.mxu1 }
 0x200   :  { %v5583_v42 = vpop.f32.mrf.mxu0  ;;  %v5590_v11 = vsel %vm6767_vm2, %v2336_v13, %v2337_v34  ;;  %v5596_v47 = vsel %vm6769_vm1, %v2335_v59, %v2336_v13  ;;  %v2339_v52 = vrot.slane %v3762_v35, 7  ;;  %v2422_v35 = vrot.slane %v5512_v25, 1  ;;  %vm6781_vm2 = vmmov %vm6780_vm13 }
 0x201   :  { %6768 = vst [vmem:[#allocation29_spill] sm:$0xff] %v5590_v11  ;;  %v1992_v8 = vpop.f32.mrf.mxu1  ;;  %vm6782_vm1 = vmmov %vm6755_vm0 }
 0x202   :  { %v5592_v2 = vpop.f32.mrf.mxu0  ;;  %v2338_v3 = vrot.slane %v1992_v8, 7 }
 0x204   :  { %v5602_v56 = vsel %vm6770_vm8, %v2338_v3, %v2339_v52  ;;  %v5608_v54 = vsel %vm6755_vm0, %v2337_v34, %v2338_v3  ;;  %vm6786_vm8 = vmmov %vm6781_vm2 }
 0x205   :  { %6771 = vst [vmem:[#allocation38_spill] sm:$0xff] %v5602_v56  ;;  %6772 = vst [vmem:[#allocation36_spill] sm:$0xff] %v5608_v54  ;;  %v6850_v54 = vld [vmem:[#allocation20_spill] sm:$0xff] }
 0x208   :  { %v3765_v46 = vpop.f32.mrf.mxu1 }
 0x209   :  { %v5598_v45 = vpop.f32.mrf.mxu0  ;;  %v2341_v30 = vrot.slane %v3765_v46, 7  ;;  %v2421_v46 = vrot.slane %v5491_v41, 1 }
 0x20a   :  { %v2002_v49 = vpop.f32.mrf.mxu1 }
 0x20b   :  { %v5604_v22 = vpop.f32.mrf.mxu0  ;;  %v2340_v59 = vrot.slane %v2002_v49, 7  ;;  %v2424_v49 = vrot.slane %v5520_v27, 1  ;;  %v5642_v27 = vsel %vm6780_vm13, %v2421_v46, %v2422_v35  ;;  %vm6794_vm13 = vmmov %vm6755_vm0 }
 0x20d   :  { %v3768_v32 = vpop.f32.mrf.mxu1  ;;  %v5614_v29 = vsel %vm6773_vm10, %v2340_v59, %v2341_v30  ;;  %v5620_v13 = vsel %vm6775_vm7, %v2339_v52, %v2340_v59  ;;  %v2423_v52 = vrot.slane %v5501_v14, 1  ;;  %v2425_v14 = vrot.slane %v5514_v17, 1  ;;  %vm6787_vm10 = vmmov %vm6781_vm2 }
 0x20e   :  { %v5610_v5 = vpop.f32.mrf.mxu0  ;;  %6774 = vst [vmem:[#allocation41_spill] sm:$0xff] %v5614_v29  ;;  %6776 = vst [vmem:[#allocation33_spill] sm:$0xff] %v5620_v13  ;;  %v2343_v34 = vrot.slane %v3768_v32, 7  ;;  %v2426_v32 = vrot.slane %v5535_v39, 1  ;;  %v2428_v29 = vrot.slane %v5547_v16, 1  ;;  %v6785_v17 = vrot.slane %v5498_v0, 1 }
 0x20f   :  { %v2012_v43 = vpop.f32.mrf.mxu1  ;;  %v5650_v55 = vsel %vm6781_vm2, %v2423_v52, %v2424_v49  ;;  %vm6790_vm7 = vmmov %vm6781_vm2 }
 0x210   :  { %v5616_v36 = vpop.f32.mrf.mxu0  ;;  %v2342_v62 = vrot.slane %v2012_v43, 7  ;;  %v5666_v16 = vsel %vm6786_vm8, %v6785_v17, %v2421_v46  ;;  %v5675_v57 = vsel %vm6787_vm10, %v2425_v14, %v2426_v32  ;;  %vm6801_vm8 = vmmov %vm6755_vm0 }
 0x211   :  { %v3771_v8 = vpop.f32.mrf.mxu1  ;;  %6788 = vst [vmem:[#allocation23_spill] sm:$0xff] %v5675_v57 }
 0x212   :  { %v5623_v3 = vpop.f32.mrf.mxu0  ;;  %v5629_v9 = vsel %vm6777_vm3, %v2342_v62, %v2343_v34  ;;  %v5637_v25 = vsel %vm6779_vm14, %v2341_v30, %v2342_v62  ;;  %v2345_v41 = vrot.slane %v3771_v8, 7  ;;  %v2427_v30 = vrot.slane %v5526_v28, 1  ;;  %vm6791_vm3 = vmmov %vm6781_vm2 }
 0x213   :  { %6778 = vst [vmem:[#allocation22_spill] sm:$0xff] %v5629_v9  ;;  %v2022_v59 = vpop.f32.mrf.mxu1  ;;  %vm6793_vm14 = vmmov %vm6781_vm2 }
 0x214   :  { %v5633_v56 = vpop.f32.mrf.mxu0  ;;  %v2344_v43 = vrot.slane %v2022_v59, 7  ;;  %v5697_v0 = vsel %vm6793_vm14, %v2427_v30, %v2428_v29  ;;  %v6877_v59 = vsel %vm4531_vm5, 0.0, %v5524_v23 }
 0x216   :  { %v5644_v11 = vpop.f32.mrf.mxu0  ;;  %v5654_v39 = vsel %vm6782_vm1, %v2344_v43, %v2345_v41  ;;  %v5670_v48 = vsel %vm6755_vm0, %v2343_v34, %v2344_v43  ;;  %v2429_v43 = vrot.slane %v5541_v18, 1  ;;  %vm6799_vm1 = vmmov %vm6791_vm3 }
 0x217   :  { %v3774_v9 = vpop.f32.mrf.mxu1  ;;  %6783 = vst [vmem:[#allocation3_spill] sm:$0xff] %v5654_v39  ;;  %v2430_v39 = vrot.slane %v5559_v31, 1  ;;  %v5687_v31 = vsel %vm6790_vm7, %v2422_v35, %v2423_v52  ;;  %v6797_v52 = vld [vmem:[#allocation31_spill] sm:$0xff]  ;;  %vm6802_vm0 = vmmov %vm6799_vm1  ;;  %vm6805_vm7 = vnez %v6467_v53 }
 0x218   :  { %v5657_v8 = vpop.f32.mrf.mxu0  ;;  %v2347_v28 = vrot.slane %v3774_v9, 7  ;;  %v5691_v9 = vsel %vm6791_vm3, %v2424_v49, %v2425_v14  ;;  %vm6798_vm2 = vnez %v6797_v52  ;;  %v2434_v49 = vrot.slane %v5592_v2, 1  ;;  %vm6806_vm3 = vmmov %vm6802_vm0 }
 0x219   :  { %v2032_v62 = vpop.f32.mrf.mxu1  ;;  %6792 = vst [vmem:[#allocation26_spill] sm:$0xff] %v5691_v9  ;;  %v5722_v35 = vsel %vm6802_vm0, %v2429_v43, %v2430_v39  ;;  %vm6809_vm14 = vmmov %vm6802_vm0  ;;  %v2440_v2 = vrot.slane %v5633_v56, 1 }
 0x21a   :  { %v2346_v20 = vrot.slane %v2032_v62, 7  ;;  %v2432_v62 = vrot.slane %v5571_v21, 1  ;;  %v5713_v21 = vsel %vm6799_vm1, %v2426_v32, %v2427_v30  ;;  %v6803_v32 = vld [vmem:[#allocation39_spill] sm:$0xff] }
 0x21b   :  { %6800 = vst [vmem:[#allocation31_spill] sm:$0xff] %v5713_v21  ;;  %vm6804_vm10 = vnez %v6803_v32 }
 0x21c   :  { %v3777_v4 = vpop.f32.mrf.mxu1  ;;  %v5677_v24 = vpop.f32.mrf.mxu0  ;;  %v5701_v46 = vsel %vm6794_vm13, %v2346_v20, %v2347_v28  ;;  %v5717_v14 = vsel %vm6801_vm8, %v2345_v41, %v2346_v20  ;;  %vm6810_vm13 = vmmov %vm6801_vm8  ;;  %v2433_v20 = vrot.slane %v5565_v61, 1 }
 0x21d   :  { %6795 = vst [vmem:[#allocation28_spill] sm:$0xff] %v5701_v46  ;;  %v2431_v46 = vrot.slane %v5553_v37, 1  ;;  %v2349_v9 = vrot.slane %v3777_v4, 7  ;;  %v5737_v4 = vsel %vm6806_vm3, %v2428_v29, %v2429_v43  ;;  %v2436_v37 = vrot.slane %v5604_v22, 1  ;;  %v6812_v29 = vld [vmem:[#allocation42_spill] sm:$0xff]  ;;  %vm6814_vm8 = vmmov %vm6802_vm0  ;;  %v6817_v22 = vld [vmem:[#allocation44_spill] sm:$0xff] }
 0x21e   :  { %v2042_v34 = vpop.f32.mrf.mxu1  ;;  %v5703_v10 = vpop.f32.mrf.mxu0  ;;  %6807 = vst [vmem:[#allocation39_spill] sm:$0xff] %v5737_v4  ;;  %vm6813_vm1 = vnez %v6812_v29  ;;  %vm6816_vm0 = vmmov %vm6810_vm13  ;;  %v2435_v4 = vrot.slane %v5583_v42, 1  ;;  %vm6855_vm3 = vcmp.lt.s32.totalorder %v4420_v19, 7 }
 0x21f   :  { %v2348_v44 = vrot.slane %v2042_v34, 7  ;;  %v5745_v34 = vsel %vm6809_vm14, %v2431_v46, %v2432_v62  ;;  %v5759_v43 = vsel %vm6814_vm8, %v2430_v39, %v2431_v46  ;;  %vm6820_vm14 = vmmov %vm6814_vm8  ;;  %v2441_v46 = vrot.slane %v5623_v3, 1 }
 0x220   :  { %6815 = vst [vmem:[#allocation42_spill] sm:$0xff] %v5759_v43  ;;  %v5779_v42 = vsel %vm6820_vm14, %v2433_v20, %v2434_v49 }
 0x221   :  { %v5725_v57 = vpop.f32.mrf.mxu1  ;;  %v5749_v30 = vsel %vm6810_vm13, %v2348_v44, %v2349_v9  ;;  %v5763_v41 = vsel %vm6816_vm0, %v2347_v28, %v2348_v44  ;;  %v2442_v28 = vrot.slane %v5657_v8, 1  ;;  %vm6821_vm13 = vmmov %vm6814_vm8  ;;  %v2439_v44 = vrot.slane %v5610_v5, 1 }
 0x222   :  { %v5727_v18 = vpop.f32.mrf.mxu0  ;;  %6811 = vst [vmem:[#allocation47_spill] sm:$0xff] %v5749_v30  ;;  %v2438_v30 = vrot.slane %v5616_v36, 1  ;;  %v6403_v61 = vrot.slane %v5725_v57, 7  ;;  %v2437_v36 = vrot.slane %v5598_v45, 1  ;;  %v5787_v56 = vsel %vm6821_vm13, %v2435_v4, %v2436_v37  ;;  %vm6823_vm8 = vmmov %vm6816_vm0  ;;  %v6914_v32 = vld [vmem:[#allocation31_spill] sm:$0xff] }
 0x223   :  { %v2052_v21 = vpop.f32.mrf.mxu1  ;;  %6822 = vst [vmem:[#allocation44_spill] sm:$0xff] %v5787_v56  ;;  %vm6826_vm14 = vmmov %vm6821_vm13 }
 0x224   :  { %v5752_v1 = vpop.f32.mrf.mxu0  ;;  %v2350_v38 = vrot.slane %v2052_v21, 7  ;;  %v5803_v8 = vsel %vm6826_vm14, %v2432_v62, %v2433_v20  ;;  %vm6827_vm13 = vmmov %vm6823_vm8  ;;  %v2444_v62 = vrot.slane %v5703_v10, 1 }
 0x225   :  { %vm6830_vm15 = vmmov %vm6826_vm14 }
 0x226   :  { %v5769_v53 = vpop.f32.mrf.mxu1  ;;  %v5783_v21 = vpop.f32.mrf.mxu0  ;;  %v5793_v39 = vsel %vm6823_vm8, %v2350_v38, %v6403_v61  ;;  %v5807_v50 = vsel %vm6827_vm13, %v2349_v9, %v2350_v38  ;;  %v6828_v61 = vld [vmem:[#allocation45_spill] sm:$0xff]  ;;  %vm6832_vm0 = vmmov %vm6826_vm14  ;;  %v2443_v9 = vrot.slane %v5644_v11, 1  ;;  %v6848_v38 = vld [vmem:[#allocation11_spill] sm:$0xff]  ;;  %vm6851_vm14 = vnez %v6850_v54 }
 0x227   :  { %6824 = vst [vmem:[#allocation48_spill] sm:$0xff] %v5793_v39  ;;  %v5815_v39 = vsel %vm6830_vm15, %v2434_v49, %v2435_v4  ;;  %v5819_v45 = vsel %vm6832_vm0, %v2437_v36, %v2438_v30  ;;  %vm6836_vm8 = vmmov %vm6832_vm0  ;;  %v2446_v4 = vrot.slane %v5752_v1, 1  ;;  %v5844_v3 = vsel %vm6832_vm0, %v2441_v46, %v2442_v28  ;;  %v6969_v54 = vld [vmem:[#allocation3_spill] sm:$0xff] }
 0x228   :  { %v5796_v43 = vpop.f32.mrf.mxu1  ;;  %6831 = vst [vmem:[#allocation45_spill] sm:$0xff] %v5815_v39  ;;  %v5832_v49 = vsel %vm6836_vm8, %v2439_v44, %v2440_v2  ;;  %v5835_v5 = vpop.f32.mrf.mxu0  ;;  %vm6837_vm15 = vmmov %vm6832_vm0 }
 0x229   :  { %v5840_v39 = vsel %vm6837_vm15, %v2436_v37, %v2437_v36  ;;  %6839 = vst [vmem:[#allocation50_spill] sm:$0xff] %v5844_v3  ;;  %vm6844_vm13 = vmmov %vm6832_vm0  ;;  %v2445_v36 = vrot.slane %v5677_v24, 1  ;;  %vm6847_vm15 = vcmp.lt.s32.totalorder %v4420_v19, 1  ;;  %vm6849_vm0 = vnez %v6848_v38 }
 0x22a   :  { %v5822_v20 = vpop.f32.mrf.mxu1  ;;  %6838 = vst [vmem:[#allocation49_spill] sm:$0xff] %v5840_v39  ;;  %v5857_v37 = vsel %vm6844_vm13, %v2438_v30, %v2439_v44  ;;  %v6845_v39 = vrot.slane %v5496_v60, 7  ;;  %v6853_v60 = vld [vmem:[#allocation6_spill] sm:$0xff]  ;;  %v5887_v10 = vpop.f32.mrf.mxu0  ;;  %vm6859_vm13 = vmmov %vm6855_vm3 }
 0x22b   :  { %v6846_v11 = vrot.slane %v5822_v20, 7  ;;  %6858 = vst [vmem:[#allocation20_spill] sm:$0xff] %v5887_v10  ;;  %v5892_v24 = vsel %vm6859_vm13, %v2442_v28, %v2443_v9  ;;  %vm6861_vm8 = vmmov %vm6855_vm3  ;;  %vm6864_vm13 = vnez %v6593_v33 }
 0x22c   :  { %v5847_v56 = vpop.f32.mrf.mxu1  ;;  %6860 = vst [vmem:[#allocation6_spill] sm:$0xff] %v5892_v24  ;;  %v5896_v30 = vsel %vm6861_vm8, %v2445_v36, %v2446_v4  ;;  %v5919_v7 = vsel %vm6861_vm8, %v2444_v62, %v2445_v36 }
 0x22d   :  { %v2387_v15 = vsel %vm6847_vm15, %v6846_v11, %v6845_v39  ;;  %v5880_v39 = vsel %vm6855_vm3, %v2440_v2, %v2441_v46  ;;  %vm6857_vm15 = vmmov %vm6855_vm3  ;;  %v2448_v11 = vrot.slane %v5835_v5, 1  ;;  %v2447_v2 = vrot.slane %v5727_v18, 1  ;;  %v5903_v5 = vld [vmem:[%s6274_s4] ss:$0 sm:$0xff] }
 0x22e   :  { %v3869_v13 = vpop.f32.mrf.mxu1  ;;  %6856 = vst [vmem:[#allocation11_spill] sm:$0xff] %v5880_v39  ;;  %v5884_v44 = vsel %vm6857_vm15, %v2443_v9, %v2444_v62  ;;  %v2352_v46 = vrot.slane %v5796_v43, 7  ;;  %v6862_v39 = vld [vmem:[#allocation34_spill] sm:$0xff]  ;;  %v6865_v9 = vsel %vm4522_vm4, 0.0, %v5642_v27  ;;  %v6868_v27 = vld [vmem:[#allocation8_spill] sm:$0xff]  ;;  %vm6875_vm15 = vcmp.lt.s32.totalorder %v4420_v19, 1 }
 0x22f   :  { %v2588_v1 = vadd.f32 %v3869_v13, %v5510_v63  ;;  %vm6863_vm3 = vnez %v6862_v39  ;;  %v2449_v39 = vrot.slane %v5783_v21, 1  ;;  %v6413_v21 = vrot.slane %v5887_v10, 1 }
 0x230   :  { %v2388_v63 = vsel %vm6863_vm3, 0.0, %v2387_v15  ;;  %v2582_v13 = vpop.f32.mrf.mxu1  ;;  %v2353_v15 = vrot.slane %v5769_v53, 7  ;;  %vm6871_vm3 = vmmov %vm6861_vm8  ;;  %vm6872_vm8 = vnez %v6638_v26 }
 0x231   :  { %v2742_v18 = vadd.f32 %v2588_v1, %v6865_v9  ;;  %v2583_v24 = vadd.f32 %v2582_v13, %v2388_v63  ;;  %v5929_v63 = vpop.f32.mrf.mxu0  ;;  %v5936_v53 = vsel %vm6871_vm3, %v2447_v2, %v2448_v11  ;;  %vm6873_vm4 = vmmov %vm6871_vm3 }
 0x232   :  { %v3872_v33 = vpop.f32.mrf.mxu1  ;;  %6870 = vst [vmem:[#allocation34_spill] sm:$0xff] %v5929_v63  ;;  %v5944_v1 = vsel %vm6873_vm4, %v2446_v4, %v2447_v2  ;;  %v2354_v2 = vrot.slane %v5847_v56, 7  ;;  %vm6880_vm4 = vcmp.lt.s32.totalorder %v4420_v19, 1  ;;  %vm6881_vm5 = vmmov %vm6871_vm3 }
 0x233   :  { %v2781_v13 = vadd.f32 %v5903_v5, %v2742_v18  ;;  %v2741_v62 = vadd.f32 %v2583_v24, %v5666_v16  ;;  %v2598_v36 = vadd.f32 %v3872_v33, %v5518_v6  ;;  %v6874_v18 = vrot.slane %v5725_v57, 7 }
 0x234   :  { %v2592_v9 = vpop.f32.mrf.mxu1  ;;  %v6876_v24 = vsel %vm4556_vm6, 0.0, %v5650_v55  ;;  %v5968_v40 = vsel %vm6880_vm4, %v2352_v46, %v2353_v15  ;;  %v5974_v23 = vsel %vm6881_vm5, %v2448_v11, %v2449_v39  ;;  %vm6883_vm6 = vcmask 523264   ;;  %vm6889_vm4 = vmmov %vm6881_vm5 }
 0x235   :  { %v5950_v33 = vsel %vm6875_vm15, %v6874_v18, %v2352_v46  ;;  %v2813_v6 = vmax.f32 %v2781_v13, 0.0  ;;  %v2780_v16 = vadd.f32 %v5903_v5, %v2741_v62  ;;  %v2744_v28 = vadd.f32 %v2598_v36, %v6876_v24  ;;  %v6878_v18 = vld [vmem:[#allocation9_spill] sm:$0xff]  ;;  %6882 = vst [vmem:[#allocation13_spill] sm:$0xff] %v5974_v23  ;;  %v6885_v24 = vld [vmem:[#allocation14_spill] sm:$0xff]  ;;  %vm6891_vm15 = vmmov %vm6883_vm6 }
 0x236   :  { %v2593_v4 = vadd.f32 %v2592_v9, %v6877_v59  ;;  %v3875_v3 = vpop.f32.mrf.mxu1  ;;  %v6884_v59 = vld [vmem:[#allocation21_spill] sm:$0xff]  ;;  %vm6886_vm3 = vnez %v6885_v24  ;;  %vm6897_vm5 = vmmov %vm6889_vm4 }
 0x237   :  { %v2812_v55 = vmax.f32 %v2780_v16, 0.0  ;;  %v2783_v62 = vadd.f32 %v5903_v5, %v2744_v28  ;;  %v2845_v56 = vsel %vm6883_vm6, %v2813_v6, 0.0  ;;  %v2608_v36 = vadd.f32 %v3875_v3, %v6884_v59  ;;  %v6887_v46 = vld [vmem:[#allocation17_spill] sm:$0xff] }
 0x238   :  { %v2743_v17 = vadd.f32 %v2593_v4, %v5687_v31  ;;  %v2602_v9 = vpop.f32.mrf.mxu1  ;;  %v6888_v57 = vrot.slane %v6887_v46, 1  ;;  %v6892_v3 = vsel %vm6798_vm2, 0.0, %v5539_v58  ;;  %v6894_v46 = vld [vmem:[#allocation23_spill] sm:$0xff]  ;;  %vm6904_vm2 = vmmov %vm6883_vm6 }
 0x239   :  { %v2844_v11 = vsel %vm6891_vm15, %v2812_v55, 0.0  ;;  %v2815_v28 = vmax.f32 %v2783_v62, 0.0  ;;  %v2603_v16 = vadd.f32 %v2602_v9, %v6892_v3  ;;  %v6895_v13 = vsel %vm4584_vm9, 0.0, %v6894_v46  ;;  %v6901_v9 = vld [vmem:[#allocation16_spill] sm:$0xff] }
 0x23a   :  { %v5987_v31 = vsel %vm6889_vm4, %v6413_v21, %v6888_v57  ;;  %v2782_v6 = vadd.f32 %v5903_v5, %v2743_v17  ;;  %v2846_v4 = vadd.f32 %v2845_v56, %v2844_v11  ;;  %v2746_v10 = vadd.f32 %v2608_v36, %v6895_v13  ;;  %v3878_v23 = vpop.f32.mrf.mxu1  ;;  %v6900_v17 = vld [vmem:[#allocation26_spill] sm:$0xff]  ;;  %v6902_v13 = vld [vmem:[#allocation12_spill] sm:$0xff]  ;;  %vm6907_vm4 = vmmov %vm6904_vm2 }
 0x23b   :  { %6890 = vst [vmem:[#allocation8_spill] sm:$0xff] %v5987_v31  ;;  %v6896_v57 = vrot.slane %v5929_v63, 1  ;;  %v6898_v62 = vrot.slane %v5822_v20, 7  ;;  %vm6899_vm15 = vcmp.lt.s32.totalorder %v4420_v19, 1  ;;  %v2745_v56 = vadd.f32 %v2603_v16, %v6900_v17  ;;  %v6910_v17 = vld [vmem:[#allocation24_spill] sm:$0xff] }
 0x23c   :  { %v2814_v58 = vmax.f32 %v2782_v6, 0.0  ;;  %v2618_v11 = vadd.f32 %v3878_v23, %v6901_v9  ;;  %vm6903_vm9 = vnez %v6902_v13  ;;  %v2847_v3 = vrot.slane %v2846_v4, 4  ;;  %v2612_v46 = vpop.f32.mrf.mxu1  ;;  %vm6905_vm6 = vmmov %vm6899_vm15 }
 0x23d   :  { %v6003_v55 = vsel %vm6897_vm5, %v2449_v39, %v6896_v57  ;;  %v6009_v52 = vsel %vm6899_vm15, %v2354_v2, %v6898_v62  ;;  %v2854_v59 = vsel %vm6904_vm2, %v2815_v28, 0.0  ;;  %v2785_v39 = vadd.f32 %v5903_v5, %v2746_v10  ;;  %vm6919_vm15 = vmmov %vm6904_vm2 }
 0x23e   :  { %v6020_v20 = vsel %vm6905_vm6, %v2353_v15, %v2354_v2  ;;  %v2853_v6 = vsel %vm6907_vm4, %v2814_v58, 0.0  ;;  %v2784_v16 = vadd.f32 %v5903_v5, %v2745_v56  ;;  %v6908_v23 = vsel %vm6804_vm10, 0.0, %v5697_v0  ;;  %v3881_v19 = vpop.f32.mrf.mxu1  ;;  %v6912_v15 = vld [vmem:[#allocation10_spill] sm:$0xff]  ;;  %v6915_v0 = vld [vmem:[#allocation25_spill] sm:$0xff]  ;;  %vm6916_vm10 = vmmov %vm6904_vm2 }
 0x23f   :  { %6906 = vst [vmem:[#allocation9_spill] sm:$0xff] %v6020_v20  ;;  %v2748_v57 = vadd.f32 %v2618_v11, %v6908_v23  ;;  %v6911_v28 = vsel %vm6805_vm7, 0.0, %v6910_v17  ;;  %v2848_v10 = vadd.f32 %v2847_v3, %v2846_v4  ;;  %v2855_v21 = vadd.f32 %v2854_v59, %v2853_v6  ;;  %v6917_v4 = vld [vmem:[#allocation15_spill] sm:$0xff] }
 0x240   :  { %v2613_v9 = vadd.f32 %v2612_v46, %v6911_v28  ;;  %v2817_v36 = vmax.f32 %v2785_v39, 0.0  ;;  %vm6913_vm5 = vnez %v6912_v15  ;;  %v2816_v58 = vmax.f32 %v2784_v16, 0.0  ;;  %v2622_v46 = vpop.f32.mrf.mxu1 }
 0x241   :  { %v2787_v56 = vadd.f32 %v5903_v5, %v2748_v57  ;;  %v2628_v11 = vadd.f32 %v3881_v19, %v6915_v0  ;;  %v2849_v23 = vrot.slane %v2848_v10, 2  ;;  %v2856_v62 = vrot.slane %v2855_v21, 4 }
 0x242   :  { %v2747_v63 = vadd.f32 %v2613_v9, %v6914_v32  ;;  %v2863_v17 = vsel %vm6916_vm10, %v2817_v36, 0.0  ;;  %vm6918_vm7 = vnez %v6917_v4  ;;  %v2862_v59 = vsel %vm6919_vm15, %v2816_v58, 0.0  ;;  %v6922_v36 = vld [vmem:[#allocation18_spill] sm:$0xff]  ;;  %v3884_v4 = vpop.f32.mrf.mxu1 }
 0x243   :  { %v2819_v39 = vmax.f32 %v2787_v56, 0.0  ;;  %v6920_v16 = vsel %vm6813_vm1, 0.0, %v5722_v35  ;;  %v2850_v19 = vadd.f32 %v2849_v23, %v2848_v10  ;;  %v2857_v28 = vadd.f32 %v2856_v62, %v2855_v21  ;;  %vm6926_vm1 = vmmov %vm6904_vm2 }
 0x244   :  { %v2786_v6 = vadd.f32 %v5903_v5, %v2747_v63  ;;  %v2750_v57 = vadd.f32 %v2628_v11, %v6920_v16  ;;  %v2864_v9 = vadd.f32 %v2863_v17, %v2862_v59  ;;  %v6923_v0 = vsel %vm4629_vm12, 0.0, %v6922_v36  ;;  %v6924_v63 = vld [vmem:[#allocation32_spill] sm:$0xff]  ;;  %v6925_v11 = vld [vmem:[#allocation39_spill] sm:$0xff]  ;;  %v2632_v21 = vpop.f32.mrf.mxu1  ;;  %vm6933_vm4 = vmmov %vm6926_vm1 }
 0x245   :  { %v2623_v2 = vadd.f32 %v2622_v46, %v6923_v0  ;;  %v2872_v3 = vsel %vm6904_vm2, %v2819_v39, 0.0  ;;  %v2638_v20 = vadd.f32 %v3884_v4, %v6924_v63  ;;  %v2851_v29 = vrot.slane %v2850_v19, 1  ;;  %v6929_v59 = vld [vmem:[#allocation43_spill] sm:$0xff]  ;;  %vm6940_vm2 = vmmov %vm6926_vm1 }
 0x246   :  { %v2818_v58 = vmax.f32 %v2786_v6, 0.0  ;;  %v2789_v56 = vadd.f32 %v5903_v5, %v2750_v57  ;;  %v2858_v31 = vrot.slane %v2857_v28, 2  ;;  %v2865_v35 = vrot.slane %v2864_v9, 4  ;;  %v6931_v39 = vld [vmem:[#allocation19_spill] sm:$0xff] }
 0x247   :  { %v2749_v10 = vadd.f32 %v2623_v2, %v6925_v11  ;;  %vm6927_vm12 = vnez %v6817_v22  ;;  %vm6930_vm6 = vnez %v6929_v59  ;;  %v6065_v4 = vadd.f32 %v2851_v29, %v2850_v19  ;;  %v3887_v2 = vpop.f32.mrf.mxu1 }
 0x248   :  { %v2871_v23 = vsel %vm6926_vm1, %v2818_v58, 0.0  ;;  %v2821_v62 = vmax.f32 %v2789_v56, 0.0  ;;  %v6928_v17 = vsel %vm6927_vm12, 0.0, %v5745_v34  ;;  %v6932_v6 = vsel %vm6930_vm6, 0.0, %v6931_v39  ;;  %v6934_v56 = vld [vmem:[#allocation42_spill] sm:$0xff]  ;;  %vm6941_vm12 = vmmov %vm6926_vm1 }
 0x249   :  { %v2752_v46 = vadd.f32 %v2638_v20, %v6928_v17  ;;  %v2633_v16 = vadd.f32 %v2632_v21, %v6932_v6  ;;  %v2859_v57 = vadd.f32 %v2858_v31, %v2857_v28  ;;  %v2866_v32 = vadd.f32 %v2865_v35, %v2864_v9  ;;  %v6935_v17 = vld [vmem:[#allocation29_spill] sm:$0xff]  ;;  %v2642_v21 = vpop.f32.mrf.mxu1 }
 0x24a   :  { %v2873_v36 = vadd.f32 %v2872_v3, %v2871_v23  ;;  %v2881_v0 = vsel %vm6933_vm4, %v2821_v62, 0.0  ;;  %v2788_v58 = vadd.f32 %v5903_v5, %v2749_v10  ;;  %v2648_v59 = vadd.f32 %v3887_v2, %v6935_v17 }
 0x24b   :  { %v2791_v22 = vadd.f32 %v5903_v5, %v2752_v46  ;;  %v2751_v34 = vadd.f32 %v2633_v16, %v6934_v56  ;;  %v2860_v20 = vrot.slane %v2859_v57, 1  ;;  %v2867_v63 = vrot.slane %v2866_v32, 2  ;;  %v3890_v46 = vpop.f32.mrf.mxu1  ;;  %v6943_v56 = vld [vmem:[#allocation46_spill] sm:$0xff] }
 0x24c   :  { %v2874_v11 = vrot.slane %v2873_v36, 4  ;;  %v2820_v19 = vmax.f32 %v2788_v58, 0.0  ;;  %vm6936_vm10 = vnez %v6494_v12  ;;  %vm6938_vm15 = vnez %v6828_v61 }
 0x24d   :  { %v2823_v29 = vmax.f32 %v2791_v22, 0.0  ;;  %v2790_v31 = vadd.f32 %v5903_v5, %v2751_v34  ;;  %v6937_v3 = vsel %vm6936_vm10, 0.0, %v5596_v47  ;;  %v6077_v9 = vadd.f32 %v2860_v20, %v2859_v57  ;;  %v6945_v34 = vld [vmem:[#allocation36_spill] sm:$0xff]  ;;  %vm6953_vm10 = vmmov %vm6926_vm1 }
 0x24e   :  { %v2643_v28 = vadd.f32 %v2642_v21, %v6937_v3  ;;  %v2868_v35 = vadd.f32 %v2867_v63, %v2866_v32  ;;  %v2875_v10 = vadd.f32 %v2874_v11, %v2873_v36  ;;  %v6939_v23 = vsel %vm6938_vm15, 0.0, %v5779_v42  ;;  %v2652_v32 = vpop.f32.mrf.mxu1  ;;  %v6942_v42 = vld [vmem:[#allocation38_spill] sm:$0xff]  ;;  %vm6954_vm15 = vmmov %vm6926_vm1 }
 0x24f   :  { %v2754_v62 = vadd.f32 %v2648_v59, %v6939_v23  ;;  %v2880_v39 = vsel %vm6940_vm2, %v2820_v19, 0.0  ;;  %v2890_v6 = vsel %vm6926_vm1, %v2823_v29, 0.0  ;;  %v2822_v16 = vmax.f32 %v2790_v31, 0.0  ;;  %v6947_v29 = vld [vmem:[#allocation2_spill] sm:$0xff]  ;;  %v6949_v31 = vld [vmem:[#allocation44_spill] sm:$0xff]  ;;  %v6951_v23 = vld [vmem:[#allocation45_spill] sm:$0xff] }
 0x250   :  { %v2753_v12 = vadd.f32 %v2643_v28, %v5803_v8  ;;  %v2869_v2 = vrot.slane %v2868_v35, 1  ;;  %v2876_v47 = vrot.slane %v2875_v10, 2  ;;  %v2882_v58 = vadd.f32 %v2881_v0, %v2880_v39  ;;  %v3893_v0 = vpop.f32.mrf.mxu1 }
 0x251   :  { %v2793_v57 = vadd.f32 %v5903_v5, %v2754_v62  ;;  %v2889_v36 = vsel %vm6941_vm12, %v2822_v16, 0.0  ;;  %v2658_v22 = vadd.f32 %v3890_v46, %v6942_v42  ;;  %vm6944_vm6 = vnez %v6943_v56  ;;  %vm6963_vm12 = vmmov %vm6953_vm10 }
 0x252   :  { %v2792_v61 = vadd.f32 %v5903_v5, %v2753_v12  ;;  %v6946_v20 = vsel %vm6944_vm6, 0.0, %v6945_v34  ;;  %v6094_v11 = vadd.f32 %v2869_v2, %v2868_v35  ;;  %v2877_v8 = vadd.f32 %v2876_v47, %v2875_v10  ;;  %v6952_v12 = vld [vmem:[#allocation41_spill] sm:$0xff]  ;;  %v2662_v35 = vpop.f32.mrf.mxu1  ;;  %v6955_v34 = vld [vmem:[#allocation27_spill] sm:$0xff]  ;;  %vm6964_vm6 = vmmov %vm6953_vm10 }
 0x253   :  { %v2653_v63 = vadd.f32 %v2652_v32, %v6946_v20  ;;  %v2883_v17 = vrot.slane %v2882_v58, 4  ;;  %v2891_v59 = vadd.f32 %v2890_v6, %v2889_v36  ;;  %v2825_v21 = vmax.f32 %v2793_v57, 0.0 }
 0x254   :  { %v2824_v19 = vmax.f32 %v2792_v61, 0.0  ;;  %vm6948_vm4 = vnez %v6947_v29  ;;  %v2878_v46 = vrot.slane %v2877_v8, 1  ;;  %v2668_v32 = vadd.f32 %v3893_v0, %v6952_v12  ;;  %v6960_v0 = vld [vmem:[#allocation33_spill] sm:$0xff] }
 0x255   :  { %v6950_v3 = vsel %vm6948_vm4, 0.0, %v6949_v31  ;;  %v2755_v62 = vadd.f32 %v2653_v63, %v6951_v23  ;;  %v2884_v39 = vadd.f32 %v2883_v17, %v2882_v58  ;;  %v2892_v16 = vrot.slane %v2891_v59, 4  ;;  %v6958_v17 = vld [vmem:[#allocation4_spill] sm:$0xff]  ;;  %vm6968_vm4 = vmmov %vm6964_vm6 }
 0x256   :  { %v2756_v28 = vadd.f32 %v2658_v22, %v6950_v3  ;;  %v2899_v10 = vsel %vm6953_vm10, %v2825_v21, 0.0  ;;  %v2898_v6 = vsel %vm6954_vm15, %v2824_v19, 0.0  ;;  %v6106_v57 = vadd.f32 %v2878_v46, %v2877_v8  ;;  %v3896_v22 = vpop.f32.mrf.mxu1  ;;  %v6962_v3 = vld [vmem:[#allocation22_spill] sm:$0xff] }
 0x257   :  { %v2794_v47 = vadd.f32 %v5903_v5, %v2755_v62  ;;  %v2885_v36 = vrot.slane %v2884_v39, 2  ;;  %v2893_v61 = vadd.f32 %v2892_v16, %v2891_v59  ;;  %v2900_v42 = vadd.f32 %v2899_v10, %v2898_v6  ;;  %v6965_v16 = vld [vmem:[#allocation49_spill] sm:$0xff] }
 0x258   :  { %v2795_v2 = vadd.f32 %v5903_v5, %v2756_v28  ;;  %vm6956_vm2 = vnez %v6955_v34  ;;  %vm6959_vm1 = vnez %v6958_v17  ;;  %v2678_v28 = vadd.f32 %v3896_v22, %v6962_v3  ;;  %v2672_v59 = vpop.f32.mrf.mxu1 }
 0x259   :  { %v2826_v58 = vmax.f32 %v2794_v47, 0.0  ;;  %v6957_v20 = vsel %vm6956_vm2, 0.0, %v5819_v45  ;;  %v6961_v21 = vsel %vm6959_vm1, 0.0, %v6960_v0  ;;  %v2886_v29 = vadd.f32 %v2885_v36, %v2884_v39 }
 0x25a   :  { %v2827_v56 = vmax.f32 %v2795_v2, 0.0  ;;  %v2758_v63 = vadd.f32 %v2668_v32, %v6957_v20  ;;  %v2663_v19 = vadd.f32 %v2662_v35, %v6961_v21  ;;  %v2894_v31 = vrot.slane %v2893_v61, 2  ;;  %v3899_v2 = vpop.f32.mrf.mxu1 }
 0x25b   :  { %v2901_v8 = vrot.slane %v2900_v42, 4  ;;  %v2907_v62 = vsel %vm6964_vm6, %v2826_v58, 0.0  ;;  %v2887_v12 = vrot.slane %v2886_v29, 1  ;;  %v6966_v47 = vsel %vm6849_vm0, 0.0, %v5832_v49  ;;  %vm6972_vm0 = vmmov %vm6968_vm4 }
 0x25c   :  { %v2908_v23 = vsel %vm6963_vm12, %v2827_v56, 0.0  ;;  %v2797_v46 = vadd.f32 %v5903_v5, %v2758_v63  ;;  %v2757_v45 = vadd.f32 %v2663_v19, %v6965_v16  ;;  %v2895_v32 = vadd.f32 %v2894_v31, %v2893_v61  ;;  %v2682_v20 = vpop.f32.mrf.mxu1  ;;  %vm6979_vm15 = vmmov %vm6972_vm0 }
 0x25d   :  { %v2902_v10 = vadd.f32 %v2901_v8, %v2900_v42  ;;  %v2909_v6 = vadd.f32 %v2908_v23, %v2907_v62  ;;  %v2760_v36 = vadd.f32 %v2678_v28, %v6966_v47  ;;  %v6967_v22 = vsel %vm6851_vm14, 0.0, %v5637_v25  ;;  %v6974_v62 = vld [vmem:[#allocation5_spill] sm:$0xff]  ;;  %vm6983_vm2 = vmmov %vm6972_vm0 }
 0x25e   :  { %v2829_v35 = vmax.f32 %v2797_v46, 0.0  ;;  %v2796_v39 = vadd.f32 %v5903_v5, %v2757_v45  ;;  %v2673_v56 = vadd.f32 %v2672_v59, %v6967_v22  ;;  %v6130_v58 = vadd.f32 %v2887_v12, %v2886_v29  ;;  %v3902_v31 = vpop.f32.mrf.mxu1  ;;  %v6973_v59 = vld [vmem:[#allocation28_spill] sm:$0xff]  ;;  %v6976_v46 = vld [vmem:[#allocation50_spill] sm:$0xff]  ;;  %v6978_v12 = vld [vmem:[#allocation11_spill] sm:$0xff] }
 0x25f   :  { %v2896_v34 = vrot.slane %v2895_v32, 1  ;;  %v2903_v61 = vrot.slane %v2902_v10, 2  ;;  %v2910_v42 = vrot.slane %v2909_v6, 4  ;;  %v2799_v0 = vadd.f32 %v5903_v5, %v2760_v36  ;;  %vm6990_vm12 = vmmov %vm6972_vm0 }
 0x260   :  { %v2917_v63 = vsel %vm6968_vm4, %v2829_v35, 0.0  ;;  %v2828_v17 = vmax.f32 %v2796_v39, 0.0  ;;  %v2759_v38 = vadd.f32 %v2673_v56, %v5857_v37  ;;  %v2688_v25 = vadd.f32 %v3899_v2, %v6969_v54  ;;  %vm6991_vm6 = vmmov %vm6972_vm0 }
 0x261   :  { %v6135_v49 = vadd.f32 %v2903_v61, %v2902_v10  ;;  %v6137_v21 = vadd.f32 %v2910_v42, %v2909_v6  ;;  %vm6970_vm14 = vnez %v6853_v60  ;;  %v2831_v3 = vmax.f32 %v2799_v0, 0.0  ;;  %v2692_v60 = vpop.f32.mrf.mxu1  ;;  %vm6992_vm4 = vmmov %vm6972_vm0 }
 0x262   :  { %v6971_v19 = vsel %vm6970_vm14, 0.0, %v5670_v48  ;;  %v2916_v8 = vsel %vm6972_vm0, %v2828_v17, 0.0  ;;  %v2798_v28 = vadd.f32 %v5903_v5, %v2759_v38  ;;  %v2698_v23 = vadd.f32 %v3902_v31, %v6973_v59  ;;  %v6985_v17 = vld [vmem:[#allocation47_spill] sm:$0xff] }
 0x263   :  { %v2683_v29 = vadd.f32 %v2682_v20, %v6971_v19  ;;  %v2918_v37 = vadd.f32 %v2917_v63, %v2916_v8  ;;  %vm6975_vm10 = vnez %v6974_v62  ;;  %v6152_v6 = vadd.f32 %v2896_v34, %v2895_v32  ;;  %v3905_v32 = vpop.f32.mrf.mxu1  ;;  %v6984_v63 = vld [vmem:[#allocation6_spill] sm:$0xff] }
 0x264   :  { %v6977_v16 = vsel %vm6975_vm10, 0.0, %v6976_v46  ;;  %v2926_v48 = vsel %vm6979_vm15, %v2831_v3, 0.0  ;;  %v2830_v2 = vmax.f32 %v2798_v28, 0.0  ;;  %v6980_v35 = vsel %vm5116_vm11, 0.0, %v5884_v44 }
 0x265   :  { %v2762_v45 = vadd.f32 %v2688_v25, %v6977_v16  ;;  %v2761_v10 = vadd.f32 %v2683_v29, %v6978_v12  ;;  %v2764_v39 = vadd.f32 %v2698_v23, %v6980_v35  ;;  %v6982_v36 = vsel %vm6864_vm13, 0.0, %v5717_v14  ;;  %v2702_v19 = vpop.f32.mrf.mxu1 }
 0x266   :  { %v2693_v22 = vadd.f32 %v2692_v60, %v6982_v36  ;;  %v2919_v56 = vrot.slane %v2918_v37, 4  ;;  %v2905_v34 = vrot.slane %v6135_v49, 1  ;;  %v2925_v20 = vsel %vm6983_vm2, %v2830_v2, 0.0  ;;  %vm6995_vm2 = vmmov %vm6972_vm0 }
 0x267   :  { %v2801_v61 = vadd.f32 %v5903_v5, %v2762_v45  ;;  %v2800_v42 = vadd.f32 %v5903_v5, %v2761_v10  ;;  %v2803_v43 = vadd.f32 %v5903_v5, %v2764_v39  ;;  %v2708_v0 = vadd.f32 %v3905_v32, %v6985_v17  ;;  %v3908_v16 = vpop.f32.mrf.mxu1 }
 0x268   :  { %v2763_v44 = vadd.f32 %v2693_v22, %v6984_v63  ;;  %v2920_v38 = vadd.f32 %v2919_v56, %v2918_v37  ;;  %v2927_v54 = vadd.f32 %v2926_v48, %v2925_v20  ;;  %vm3019_vm11 = vcmask 1041409   ;;  %v6993_v48 = vld [vmem:[#allocation48_spill] sm:$0xff] }
 0x269   :  { %v2833_v14 = vmax.f32 %v2801_v61, 0.0  ;;  %v2832_v25 = vmax.f32 %v2800_v42, 0.0  ;;  %v2835_v29 = vmax.f32 %v2803_v43, 0.0  ;;  %vm6986_vm13 = vnez %v6624_v51  ;;  %v2712_v2 = vpop.f32.mrf.mxu1 }
 0x26a   :  { %v2802_v31 = vadd.f32 %v5903_v5, %v2763_v44  ;;  %v6987_v8 = vsel %vm6986_vm13, 0.0, %v5896_v30  ;;  %vm6988_vm1 = vnez %v6868_v27  ;;  %v2921_v23 = vrot.slane %v2920_v38, 2 }
 0x26b   :  { %v2766_v3 = vadd.f32 %v2708_v0, %v6987_v8  ;;  %v6989_v28 = vsel %vm6988_vm1, 0.0, %v5763_v41  ;;  %v2928_v37 = vrot.slane %v2927_v54, 4  ;;  %v2935_v62 = vsel %vm6990_vm12, %v2833_v14, 0.0 }
 0x26c   :  { %v2703_v59 = vadd.f32 %v2702_v19, %v6989_v28  ;;  %v2934_v46 = vsel %vm6991_vm6, %v2832_v25, 0.0  ;;  %v2944_v12 = vsel %vm6992_vm4, %v2835_v29, 0.0  ;;  %v2834_v10 = vmax.f32 %v2802_v31, 0.0  ;;  %vm6998_vm6 = vmmov %vm6972_vm0 }
 0x26d   :  { %v2936_v45 = vadd.f32 %v2935_v62, %v2934_v46  ;;  %v2805_v51 = vadd.f32 %v5903_v5, %v2766_v3  ;;  %v2922_v30 = vadd.f32 %v2921_v23, %v2920_v38  ;;  %v2929_v60 = vadd.f32 %v2928_v37, %v2927_v54  ;;  %vm6999_vm4 = vmmov %vm6972_vm0 }
 0x26e   :  { %v2765_v27 = vadd.f32 %v2703_v59, %v5919_v7  ;;  %v2718_v41 = vadd.f32 %v3908_v16, %v6993_v48  ;;  %vm3021_vm14 = vcmask 1042434   ;;  %v2943_v39 = vsel %vm6972_vm0, %v2834_v10, 0.0  ;;  %v3911_v7 = vpop.f32.mrf.mxu1 }
 0x26f   :  { %v2937_v35 = vrot.slane %v2936_v45, 4  ;;  %v2837_v47 = vmax.f32 %v2805_v51, 0.0  ;;  %v6994_v36 = vsel %vm6872_vm8, 0.0, %v5807_v50  ;;  %vm3023_vm10 = vcmask 1043459  }
 0x270   :  { %v2713_v22 = vadd.f32 %v2712_v2, %v6994_v36  ;;  %v2923_v56 = vrot.slane %v2922_v30, 1  ;;  %v2930_v61 = vrot.slane %v2929_v60, 2  ;;  %v2945_v42 = vadd.f32 %v2944_v12, %v2943_v39  ;;  %v2722_v31 = vpop.f32.mrf.mxu1 }
 0x271   :  { %v2804_v32 = vadd.f32 %v5903_v5, %v2765_v27  ;;  %vm3025_vm15 = vcmask 1044484   ;;  %v2938_v20 = vadd.f32 %v2937_v35, %v2936_v45  ;;  %v2953_v43 = vsel %vm6995_vm2, %v2837_v47, 0.0 }
 0x272   :  { %vm6996_vm13 = vnez %v6878_v18  ;;  %v2767_v26 = vadd.f32 %v2713_v22, %v5944_v1  ;;  %vm3027_vm8 = vcmask 1045509   ;;  %v2924_v50 = vadd.f32 %v2923_v56, %v2922_v30 }
 0x273   :  { %v6997_v63 = vsel %vm6996_vm13, 0.0, %v5936_v53  ;;  %v2931_v17 = vadd.f32 %v2930_v61, %v2929_v60  ;;  %v2946_v0 = vrot.slane %v2945_v42, 4  ;;  %v2836_v38 = vmax.f32 %v2804_v32, 0.0  ;;  %v3914_v60 = vpop.f32.mrf.mxu1 }
 0x274   :  { %v2768_v44 = vadd.f32 %v2718_v41, %v6997_v63  ;;  %vm3029_vm1 = vcmask 1046534   ;;  %v2939_v54 = vrot.slane %v2938_v20, 2  ;;  %v2806_v25 = vadd.f32 %v5903_v5, %v2767_v26 }
 0x275   :  { %v2906_v19 = vadd.f32 %v2905_v34, %v6135_v49  ;;  %vm3031_vm12 = vcmask 1047559   ;;  %v2932_v18 = vrot.slane %v2931_v17, 1  ;;  %v2947_v29 = vadd.f32 %v2946_v0, %v2945_v42  ;;  %v2732_v32 = vpop.f32.mrf.mxu1  ;;  %v7007_v0 = vld [vmem:[#allocation9_spill] sm:$0xff] }
 0x276   :  { %v2807_v14 = vadd.f32 %v5903_v5, %v2768_v44  ;;  %v2952_v53 = vsel %vm6998_vm6, %v2836_v38, 0.0  ;;  %v2912_v1 = vrot.slane %v6137_v21, 2  ;;  %v2940_v8 = vadd.f32 %v2939_v54, %v2938_v20  ;;  %v7002_v44 = vld [vmem:[#allocation13_spill] sm:$0xff] }
 0x277   :  { %v2954_v3 = vadd.f32 %v2953_v43, %v2952_v53  ;;  %v2838_v59 = vmax.f32 %v2806_v25, 0.0  ;;  %v2933_v23 = vadd.f32 %v2932_v18, %v2931_v17  ;;  %v2948_v37 = vrot.slane %v2947_v29, 2 }
 0x278   :  { %v2839_v28 = vmax.f32 %v2807_v14, 0.0  ;;  %v2913_v62 = vadd.f32 %v2912_v1, %v6137_v21  ;;  %v3020_v49 = vsel %vm3019_vm11, %v6077_v9, %v6065_v4  ;;  %v2941_v34 = vrot.slane %v2940_v8, 1  ;;  %v7013_v1 = vld [vmem:[#allocation7_spill] sm:$0xff] }
 0x279   :  { %v2955_v46 = vrot.slane %v2954_v3, 4  ;;  %v2961_v45 = vsel %vm6972_vm0, %v2838_v59, 0.0  ;;  %v3033_v12 = vsel %vm3019_vm11, %v2933_v23, %v2924_v50  ;;  %v2949_v10 = vadd.f32 %v2948_v37, %v2947_v29  ;;  %v7011_v29 = vld [vmem:[#allocation34_spill] sm:$0xff]  ;;  %vm7017_vm11 = vmmov %vm6972_vm0 }
 0x27a   :  { %v2962_v16 = vsel %vm6999_vm4, %v2839_v28, 0.0  ;;  %v2914_v30 = vrot.slane %v2913_v62, 1  ;;  %v2942_v27 = vadd.f32 %v2941_v34, %v2940_v8  ;;  %v3022_v21 = vsel %vm3021_vm14, %v6094_v11, %v3020_v49 }
 0x27b   :  { %v2963_v51 = vadd.f32 %v2962_v16, %v2961_v45  ;;  %v2956_v48 = vadd.f32 %v2955_v46, %v2954_v3  ;;  %v2728_v41 = vadd.f32 %v3911_v7, %v5968_v40  ;;  %v2950_v4 = vrot.slane %v2949_v10, 1 }
 0x27c   :  { %v2915_v2 = vadd.f32 %v2914_v30, %v2913_v62  ;;  %v3024_v35 = vsel %vm3023_vm10, %v6106_v57, %v3022_v21  ;;  %v3034_v36 = vsel %vm3021_vm14, %v2942_v27, %v3033_v12  ;;  %v7000_v22 = vsel %vm6913_vm5, 0.0, %v6003_v55  ;;  %vm7003_vm5 = vmmov %vm6972_vm0 }
 0x27d   :  { %v2964_v9 = vrot.slane %v2963_v51, 4  ;;  %v2957_v39 = vrot.slane %v2956_v48, 2  ;;  %v3026_v47 = vsel %vm3025_vm15, %v6130_v58, %v3024_v35  ;;  %v2770_v56 = vadd.f32 %v2728_v41, %v7000_v22  ;;  %vm7018_vm14 = vmmov %vm6972_vm0 }
 0x27e   :  { %v2951_v11 = vadd.f32 %v2950_v4, %v2949_v10  ;;  %v3028_v40 = vsel %vm3027_vm8, %v6152_v6, %v3026_v47  ;;  %v7001_v57 = vsel %vm6886_vm3, 0.0, %v5950_v33  ;;  %v2738_v15 = vadd.f32 %v3914_v60, %v6009_v52  ;;  %v7004_v33 = vld [vmem:[#allocation8_spill] sm:$0xff] }
 0x27f   :  { %v2965_v61 = vadd.f32 %v2964_v9, %v2963_v51  ;;  %v2723_v42 = vadd.f32 %v2722_v31, %v7001_v57  ;;  %v2958_v7 = vadd.f32 %v2957_v39, %v2956_v48  ;;  %v3030_v58 = vsel %vm3029_vm1, %v2906_v19, %v3028_v40  ;;  %v7009_v19 = vld [vmem:[#allocation20_spill] sm:$0xff] }
 0x280   :  { %v2809_v20 = vadd.f32 %v5903_v5, %v2770_v56  ;;  %v3032_v43 = vsel %vm3031_vm12, %v2915_v2, %v3030_v58  ;;  %v3035_v63 = vsel %vm3023_vm10, %v2951_v11, %v3034_v36  ;;  %v7005_v24 = vsel %vm6903_vm9, 0.0, %v7004_v33  ;;  %vm7015_vm9 = vmmov %vm6972_vm0  ;;  %v3341_v56 = vld [vmem:[%s6275_s6] ss:$0 sm:$0xff] }
 0x281   :  { %v2966_v55 = vrot.slane %v2965_v61, 2  ;;  %v2769_v6 = vadd.f32 %v2723_v42, %v7002_v44  ;;  %v2959_v26 = vrot.slane %v2958_v7, 1  ;;  %3931 = vmatprep.mubr.msk.f32.mxu0 %vm7003_vm5, %v3032_v43  ;;  %v2772_v50 = vadd.f32 %v2738_v15, %v7005_v24  ;;  %vm7019_vm10 = vmmov %vm6972_vm0 }
 0x282   :  { %v7008_v38 = vsel %vm6918_vm7, 0.0, %v7007_v0  ;;  %v2841_v14 = vmax.f32 %v2809_v20, 0.0  ;;  %v7010_v18 = vrot.slane %v7009_v19, 1  ;;  %v7012_v53 = vrot.slane %v7011_v29, 1  ;;  %vm7016_vm7 = vmmov %vm6972_vm0 }
 0x283   :  { %v2733_v52 = vadd.f32 %v2732_v32, %v7008_v38  ;;  %v2967_v54 = vadd.f32 %v2966_v55, %v2965_v61  ;;  %v2808_v25 = vadd.f32 %v5903_v5, %v2769_v6  ;;  %vm7014_vm3 = vcmp.lt.s32.totalorder %v7013_v1, 7 }
 0x284   :  { %v2452_v31 = vsel %vm7014_vm3, %v7012_v53, %v7010_v18  ;;  %v2960_v13 = vadd.f32 %v2959_v26, %v2958_v7  ;;  %v2811_v8 = vadd.f32 %v5903_v5, %v2772_v50  ;;  %v2971_v34 = vsel %vm7015_vm9, %v2841_v14, 0.0 }
 0x285   :  { %v2771_v3 = vadd.f32 %v2733_v52, %v2452_v31  ;;  %v2968_v28 = vrot.slane %v2967_v54, 1  ;;  %v2840_v59 = vmax.f32 %v2808_v25, 0.0 }
 0x286   :  { %v3036_v23 = vsel %vm3025_vm15, %v2960_v13, %v3035_v63  ;;  %v2843_v37 = vmax.f32 %v2811_v8, 0.0  ;;  %vm3119_vm15 = vcmask 64512  }
 0x287   :  { %v2810_v62 = vadd.f32 %v5903_v5, %v2771_v3  ;;  %v2969_v49 = vadd.f32 %v2968_v28, %v2967_v54  ;;  %v2970_v46 = vsel %vm7016_vm7, %v2840_v59, 0.0 }
 0x288   :  { %v2972_v16 = vadd.f32 %v2971_v34, %v2970_v46  ;;  %v2980_v51 = vsel %vm7017_vm11, %v2843_v37, 0.0 }
 0x289   :  { %v2842_v45 = vmax.f32 %v2810_v62, 0.0  ;;  %v3037_v12 = vsel %vm3027_vm8, %v2969_v49, %v3036_v23 }
 0x28a   :  { %v2973_v10 = vrot.slane %v2972_v16, 4 }
 0x28b   :  { %v2979_v30 = vsel %vm7018_vm14, %v2842_v45, 0.0 }
 0x28c   :  { %v2981_v60 = vadd.f32 %v2980_v51, %v2979_v30  ;;  %v2974_v27 = vadd.f32 %v2973_v10, %v2972_v16 }
 0x28e   :  { %v2982_v48 = vrot.slane %v2981_v60, 4  ;;  %v2975_v21 = vrot.slane %v2974_v27, 2 }
 0x290   :  { %v2983_v41 = vadd.f32 %v2982_v48, %v2981_v60  ;;  %v2976_v5 = vadd.f32 %v2975_v21, %v2974_v27 }
 0x292   :  { %v2984_v4 = vrot.slane %v2983_v41, 2  ;;  %v2977_v9 = vrot.slane %v2976_v5, 1 }
 0x294   :  { %v2985_v2 = vadd.f32 %v2984_v4, %v2983_v41  ;;  %v2978_v35 = vadd.f32 %v2977_v9, %v2976_v5 }
 0x296   :  { %v2986_v39 = vrot.slane %v2985_v2, 1  ;;  %v3038_v47 = vsel %vm3029_vm1, %v2978_v35, %v3037_v12 }
 0x298   :  { %v2987_v36 = vadd.f32 %v2986_v39, %v2985_v2 }
 0x29a   :  { %v3039_v22 = vsel %vm3031_vm12, %v2987_v36, %v3038_v47 }
 0x29b   :  { %3932 = vmatmul.mubr.msk.f32.vlgmr.msra.gmra.mxu0 %vm7019_vm10, %v3039_v22 }
 0x35b   :  { %v3933_v11 = vpop.f32.mrf.mxu0 }
 0x35c   :  { %v3116_v61 = vadd.f32 %v3933_v11, %v3341_v56 }
 0x35d   :  { %v3110_v40 = vpop.f32.mrf.mxu0 }
 0x35e   :  { %3121 = vst.msk [vmem:[%s6276_s7 + $0x8] sm:$0xff] %vm3119_vm15, %v3116_v61  ;;  %v3111_v57 = vadd.f32 %v3341_v56, %v3110_v40 }
 0x360   :  { %3120 = vst.msk [vmem:[%s6276_s7] sm:$0xff] %vm3119_vm15, %v3111_v57 }

</bundles_post_ra>
